<compile_context>
chip_gen: v7x
topology: tpu7x:2x2x1
jax: 0.10.0
libtpu: 0.0.40
codegen_flags: <defaults>
</compile_context>

<pallas_src>
import jax
import jax.numpy as jnp
from jax.experimental import pallas as pl
from jax.experimental.pallas import tpu as pltpu


# ---------------------------------------------------------------------------
# Planning helpers (chunk size / batch block / VMEM budget)
# ---------------------------------------------------------------------------
def _round_up(x, m):
    return ((x + m - 1) // m) * m


def _pick_batch_block(bp):
    # Leading "parallel" grid axis over batch halves lets v7x's 2 TensorCores split the
    # recurrence; keep each block a multiple of 8 (fp32 sublane count).
    if bp % 16 == 0:
        return bp // 2
    return bp


def _layer_vmem_bytes(t_chunk, bb, e, h, out_dim=None):
    """Rough per-call VMEM footprint (double-buffered inputs/outputs + scratch)."""
    g4 = 4 * h
    b = 0
    b += 2 * t_chunk * bb * e * 2            # x chunk (bf16), double buffered
    b += 2 * e * g4 * 2                      # W_ih4 (bf16)
    b += 2 * h * g4 * 2                      # W_hh4 (bf16)
    b += 2 * g4 * 4                          # bias (f32)
    if out_dim is None:
        b += 2 * t_chunk * bb * h * 2        # hidden-sequence output (bf16)
    else:
        b += 2 * bb * out_dim * 4            # logits output (f32)
        b += 2 * h * out_dim * 2 + 2 * out_dim * 4   # fc weight / bias
    b += 2 * t_chunk * bb * g4 * 4           # pregate scratch f32 (+ temp headroom)
    b += 2 * bb * h * 4                      # h/c carry scratch
    return b


def _plan(s, bp, e_max, h, out_dim, *, cap=32, budget=20 * 1024 * 1024):
    """Pick a time-chunk size that fits the VMEM budget on every TPU generation, then pad S
    to a multiple of it (minimal padding, avoids the t_chunk=1 cliff for awkward S)."""
    bb = _pick_batch_block(bp)
    t_chunk = 1
    for tc in range(min(cap, max(s, 1)), 0, -1):
        if _layer_vmem_bytes(tc, bb, e_max, h, out_dim) <= budget:
            t_chunk = tc
            break
    n_chunks = -(-s // t_chunk)
    t_chunk = -(-s // n_chunks)              # rebalance -> padding < n_chunks steps
    s_pad = t_chunk * n_chunks
    est = max(_layer_vmem_bytes(t_chunk, bb, e_max, h, None),
              _layer_vmem_bytes(t_chunk, bb, e_max, h, out_dim))
    vmem_limit = int(min(max(2 * est, 32 << 20), 48 << 20))
    return t_chunk, s_pad, bb, vmem_limit


# ---------------------------------------------------------------------------
# Fused per-layer kernel: input projection + recurrence (+ optional final Linear)
# ---------------------------------------------------------------------------
def _make_lstm_kernel(*, t_chunk, hidden, s_real, s_pad, is_final):
    needs_mask = s_pad != s_real
    H = hidden

    def kernel(x_ref, wih_ref, whh_ref, b_ref, *rest):
        if is_final:
            fcw_ref, fcb_ref, out_ref, pre_sc, h_sc, c_sc = rest
        else:
            out_ref, pre_sc, h_sc, c_sc = rest

        chunk = pl.program_id(1)

        @pl.when(chunk == 0)
        def _init():
            h_sc[...] = jnp.zeros_like(h_sc)
            c_sc[...] = jnp.zeros_like(c_sc)

        T, Bb, E = x_ref.shape

        # Fused input projection for this chunk: one (T*Bb, E) x (E, 4H) bf16 MXU dot with
        # f32 accumulation, written to VMEM scratch (never round-trips HBM).
        x2d = x_ref[...].reshape(T * Bb, E)
        pre_sc[...] = (
            jnp.dot(x2d, wih_ref[...], preferred_element_type=jnp.float32) + b_ref[...]
        )

        w_hh = whh_ref[...]                      # (H, 4H) bf16 — all four gates in one matrix

        def step(t, carry):
            h, c = carry
            hb = h.astype(jnp.bfloat16)          # cast only at the MXU boundary
            row0 = pl.multiple_of(t * Bb, 8)     # Bb is a multiple of 8 -> sublane aligned
            z = (jnp.dot(hb, w_hh, preferred_element_type=jnp.float32)
                 + pre_sc[pl.ds(row0, Bb), :])   # (Bb, 4H), single per-step MXU dot
            i = jax.nn.sigmoid(z[:, 0 * H:1 * H])
            f = jax.nn.sigmoid(z[:, 1 * H:2 * H])
            g = jnp.tanh(z[:, 2 * H:3 * H])
            o = jax.nn.sigmoid(z[:, 3 * H:4 * H])
            c_n = f * c + i * g
            h_n = o * jnp.tanh(c_n)
            if needs_mask:
                valid = (chunk * t_chunk + t) < s_real
                h_n = jnp.where(valid, h_n, h)   # padded steps are no-ops
                c_n = jnp.where(valid, c_n, c)
            if not is_final:
                out_ref[t] = h_n.astype(out_ref.dtype)
            return h_n, c_n

        h, c = jax.lax.fori_loop(0, T, step, (h_sc[...], c_sc[...]),
                                 unroll=(T if T <= 8 else 8))
        h_sc[...] = h
        c_sc[...] = c

        if is_final:
            # Final Linear fused into the top layer's last chunk: no (S,B,H) HBM writeback.
            @pl.when(chunk == pl.num_programs(1) - 1)
            def _fc():
                out_ref[...] = (
                    jnp.dot(h.astype(jnp.bfloat16), fcw_ref[...],
                            preferred_element_type=jnp.float32)
                    + fcb_ref[...]
                ).astype(out_ref.dtype)

    return kernel


def lstm_layer_seq(x, w_ih4, w_hh4, b4, *, t_chunk, s_real, b_block, vmem_limit):
    """Intermediate layer: emits the full bf16 hidden sequence (input to the next layer)."""
    s_pad, bp, e = x.shape
    h = w_hh4.shape[0]
    n_chunks = s_pad // t_chunk
    n_bblocks = bp // b_block
    kernel = _make_lstm_kernel(t_chunk=t_chunk, hidden=h, s_real=s_real,
                               s_pad=s_pad, is_final=False)
    return pl.pallas_call(
        kernel,
        out_shape=jax.ShapeDtypeStruct((s_pad, bp, h), jnp.bfloat16),
        grid_spec=pltpu.PrefetchScalarGridSpec(
            num_scalar_prefetch=0,
            grid=(n_bblocks, n_chunks),
            in_specs=[
                pl.BlockSpec((t_chunk, b_block, e), lambda b, s: (s, b, 0)),  # x chunk
                pl.BlockSpec((e, 4 * h), lambda b, s: (0, 0)),                # W_ih4
                pl.BlockSpec((h, 4 * h), lambda b, s: (0, 0)),                # W_hh4
                pl.BlockSpec((1, 4 * h), lambda b, s: (0, 0)),                # bias
            ],
            out_specs=pl.BlockSpec((t_chunk, b_block, h), lambda b, s: (s, b, 0)),
            scratch_shapes=[
                pltpu.VMEM((t_chunk * b_block, 4 * h), jnp.float32),          # pregates
                pltpu.VMEM((b_block, h), jnp.float32),                        # h carry
                pltpu.VMEM((b_block, h), jnp.float32),                        # c carry
            ],
        ),
        compiler_params=pltpu.CompilerParams(
            dimension_semantics=("parallel", "arbitrary"),
            vmem_limit_bytes=vmem_limit),
    )(x, w_ih4, w_hh4, b4)


def lstm_layer_final_fc(x, w_ih4, w_hh4, b4, fc_w, fc_b, *, t_chunk, s_real, b_block,
                        vmem_limit):
    """Top layer: recurrence + fused final Linear -> (Bp, output_dim) logits."""
    s_pad, bp, e = x.shape
    h = w_hh4.shape[0]
    o = fc_w.shape[-1]
    n_chunks = s_pad // t_chunk
    n_bblocks = bp // b_block
    kernel = _make_lstm_kernel(t_chunk=t_chunk, hidden=h, s_real=s_real,
                               s_pad=s_pad, is_final=True)
    return pl.pallas_call(
        kernel,
        out_shape=jax.ShapeDtypeStruct((bp, o), jnp.float32),
        grid_spec=pltpu.PrefetchScalarGridSpec(
            num_scalar_prefetch=0,
            grid=(n_bblocks, n_chunks),
            in_specs=[
                pl.BlockSpec((t_chunk, b_block, e), lambda b, s: (s, b, 0)),
                pl.BlockSpec((e, 4 * h), lambda b, s: (0, 0)),
                pl.BlockSpec((h, 4 * h), lambda b, s: (0, 0)),
                pl.BlockSpec((1, 4 * h), lambda b, s: (0, 0)),
                pl.BlockSpec((h, o), lambda b, s: (0, 0)),                    # fc weight^T
                pl.BlockSpec((1, o), lambda b, s: (0, 0)),                    # fc bias
            ],
            out_specs=pl.BlockSpec((b_block, o), lambda b, s: (b, 0)),
            scratch_shapes=[
                pltpu.VMEM((t_chunk * b_block, 4 * h), jnp.float32),
                pltpu.VMEM((b_block, h), jnp.float32),
                pltpu.VMEM((b_block, h), jnp.float32),
            ],
        ),
        compiler_params=pltpu.CompilerParams(
            dimension_semantics=("parallel", "arbitrary"),
            vmem_limit_bytes=vmem_limit),
    )(x, w_ih4, w_hh4, b4, fc_w, fc_b)


# ------------------------------- Model wrapper ---------------------------------
def lstm_model_forward(params, tokens):
    """tokens: (B, S) int32. Returns logits (B, output_dim) fp32. Dropout = identity."""
    B, S = tokens.shape
    layers = params["layers"]
    H = layers[0]["w_hh4"].shape[0]
    E0 = layers[0]["w_ih4"].shape[0]
    O = params["fc_w"].shape[-1]

    # Time-major bf16 gather: transpose the tiny (B,S) token matrix, not the (B,S,E) output.
    # TODO(synk): embedding gather stays as plain-JAX glue (no clean simple Pallas gather).
    x = jnp.take(params["embedding"], tokens.T, axis=0)            # (S, B, E) bf16

    Bp = _round_up(B, 8)                                           # fp32 sublane count
    t_chunk, S_pad, Bb, vmem_limit = _plan(S, Bp, max(E0, H), H, O)
    if Bp != B or S_pad != S:
        x = jnp.pad(x, ((0, S_pad - S), (0, Bp - B), (0, 0)))

    n_layers = len(layers)
    logits = None
    for li, layer in enumerate(layers):
        if li < n_layers - 1:
            x = lstm_layer_seq(x, layer["w_ih4"], layer["w_hh4"], layer["b4"],
                               t_chunk=t_chunk, s_real=S, b_block=Bb,
                               vmem_limit=vmem_limit)               # (S_pad, Bp, H) bf16
            # inter-layer dropout: identity at inference.
        else:
            logits = lstm_layer_final_fc(x, layer["w_ih4"], layer["w_hh4"], layer["b4"],
                                         params["fc_w"], params["fc_b"],
                                         t_chunk=t_chunk, s_real=S, b_block=Bb,
                                         vmem_limit=vmem_limit)     # (Bp, O) f32
    return logits[:B]


# ----------------------- Parameter prep (one-time, outside jit) ------------------
def prepare_params(raw):
    """PyTorch-layout params -> kernel layout: transposed bf16 gate-concatenated weights
    (columns ordered i|f|g|o, as in nn.LSTM), summed fp32 biases, bf16 embedding, fc^T."""
    layers = []
    for lyr in raw["lstm"]:
        layers.append({
            "w_ih4": jnp.transpose(lyr["w_ih"]).astype(jnp.bfloat16),   # (E_in, 4H)
            "w_hh4": jnp.transpose(lyr["w_hh"]).astype(jnp.bfloat16),   # (H, 4H)
            "b4": (lyr["b_ih"] + lyr["b_hh"]).astype(jnp.float32).reshape(1, -1),
        })
    return {
        "embedding": raw["embedding"].astype(jnp.bfloat16),
        "layers": layers,
        "fc_w": jnp.transpose(raw["fc_w"]).astype(jnp.bfloat16),        # (H, O)
        "fc_b": raw["fc_b"].astype(jnp.float32).reshape(1, -1),         # (1, O)
    }


# ------------------------------ Deterministic init -----------------------------
def init_params(key, vocab_size, embedding_dim, hidden_dim, output_dim, n_layers):
    k = 1.0 / jnp.sqrt(jnp.float32(hidden_dim))
    keys = jax.random.split(key, 3 + 4 * n_layers)
    params = {
        "embedding": jax.random.normal(keys[0], (vocab_size, embedding_dim), jnp.float32),
        "lstm": [],
        "fc_w": jax.random.uniform(keys[1], (output_dim, hidden_dim), jnp.float32, -k, k),
        "fc_b": jax.random.uniform(keys[2], (output_dim,), jnp.float32, -k, k),
    }
    for l in range(n_layers):
        in_dim = embedding_dim if l == 0 else hidden_dim
        kk = keys[3 + 4 * l: 3 + 4 * (l + 1)]
        params["lstm"].append({
            "w_ih": jax.random.uniform(kk[0], (4 * hidden_dim, in_dim), jnp.float32, -k, k),
            "w_hh": jax.random.uniform(kk[1], (4 * hidden_dim, hidden_dim), jnp.float32, -k, k),
            "b_ih": jax.random.uniform(kk[2], (4 * hidden_dim,), jnp.float32, -k, k),
            "b_hh": jax.random.uniform(kk[3], (4 * hidden_dim,), jnp.float32, -k, k),
        })
    return params


# ----------------------- Pure-JAX f32 reference (for a sanity check) -------------
def lstm_reference(raw, tokens):
    x = raw["embedding"][tokens]                                   # (B, S, E) f32
    B, S, _ = x.shape
    h = None
    for lyr in raw["lstm"]:
        H = lyr["w_hh"].shape[1]
        h = jnp.zeros((B, H), jnp.float32)
        c = jnp.zeros((B, H), jnp.float32)
        b = lyr["b_ih"] + lyr["b_hh"]
        outs = []
        for t in range(S):
            z = x[:, t] @ lyr["w_ih"].T + h @ lyr["w_hh"].T + b
            i = jax.nn.sigmoid(z[:, 0:H])
            f = jax.nn.sigmoid(z[:, H:2 * H])
            g = jnp.tanh(z[:, 2 * H:3 * H])
            o = jax.nn.sigmoid(z[:, 3 * H:4 * H])
            c = f * c + i * g
            h = o * jnp.tanh(c)
            outs.append(h)
        x = jnp.stack(outs, axis=1)
    return h @ raw["fc_w"].T + raw["fc_b"]


if __name__ == "__main__":
    VOCAB, EMB, HID, OUT, NLAYERS = 50, 16, 32, 4, 2
    B, S = 2, 8

    key = jax.random.PRNGKey(0)
    pkey, tkey = jax.random.split(key)
    raw_params = init_params(pkey, VOCAB, EMB, HID, OUT, NLAYERS)
    params = prepare_params(raw_params)                 # one-time layout conversion
    tokens = jax.random.randint(tkey, (B, S), 0, VOCAB, dtype=jnp.int32)

    logits = jax.jit(lstm_model_forward)(params, tokens)
    jax.block_until_ready(logits)
    assert logits.shape == (B, OUT) and logits.dtype == jnp.float32

    ref = lstm_reference(raw_params, tokens)            # f32 reference; bf16 weights in kernel
    assert float(jnp.max(jnp.abs(logits - ref))) < 1e-1
    print("KERNEL_OK")
</pallas_src>

<mosaic_0001>
module attributes {stable_mosaic.version = 11 : i64} {
  func.func @kernel(%arg0: i32, %arg1: i32, %arg2: memref<8x8x16xbf16, #tpu.memory_space<vmem>>, %arg3: memref<16x128xbf16, #tpu.memory_space<vmem>>, %arg4: memref<32x128xbf16, #tpu.memory_space<vmem>>, %arg5: memref<1x128xf32, #tpu.memory_space<vmem>>, %arg6: memref<8x8x32xbf16, #tpu.memory_space<vmem>>, %arg7: memref<64x128xf32, #tpu.memory_space<vmem>>, %arg8: memref<8x32xf32, #tpu.memory_space<vmem>>, %arg9: memref<8x32xf32, #tpu.memory_space<vmem>>) attributes {dimension_semantics = [#tpu.dimension_semantics<parallel>, #tpu.dimension_semantics<arbitrary>], iteration_bounds = array<i64: 1, 1>, scalar_prefetch = 0 : i64, scratch_operands = 3 : i64, tpu.core_type = #tpu.core_type<tc>, window_params = [{transform_indices = @transform_0, window_bounds = array<i64: 8, 8, 16>}, {pipeline_mode = #tpu.pipeline_mode<synchronous>, transform_indices = @transform_1, window_bounds = array<i64: 16, 128>}, {pipeline_mode = #tpu.pipeline_mode<synchronous>, transform_indices = @transform_2, window_bounds = array<i64: 32, 128>}, {pipeline_mode = #tpu.pipeline_mode<synchronous>, transform_indices = @transform_3, window_bounds = array<i64: 1, 128>}, {transform_indices = @transform_4, window_bounds = array<i64: 8, 8, 32>}]} {
    %c0_i32 = arith.constant 0 : i32
    %0 = arith.cmpi eq, %arg1, %c0_i32 : i32
    %1 = arith.extui %0 : i1 to i32
    %c0_i32_0 = arith.constant 0 : i32
    %2 = arith.cmpi ne, %1, %c0_i32_0 : i32
    scf.if %2 {
      %cst_84 = arith.constant 0.000000e+00 : f32
      %312 = vector.broadcast %cst_84 : f32 to vector<8x32xf32>
      %c0_85 = arith.constant 0 : index
      %c0_86 = arith.constant 0 : index
      %313 = vector.load %arg8[%c0_85, %c0_86] : memref<8x32xf32, #tpu.memory_space<vmem>>, vector<8x32xf32>
      tpu.vector_store %arg8[%c0_85, %c0_86], %312 {strides = array<i32>} : memref<8x32xf32, #tpu.memory_space<vmem>>, vector<8x32xf32>,
      %cst_87 = arith.constant 0.000000e+00 : f32
      %314 = vector.broadcast %cst_87 : f32 to vector<8x32xf32>
      %c0_88 = arith.constant 0 : index
      %c0_89 = arith.constant 0 : index
      %315 = vector.load %arg9[%c0_88, %c0_89] : memref<8x32xf32, #tpu.memory_space<vmem>>, vector<8x32xf32>
      tpu.vector_store %arg9[%c0_88, %c0_89], %314 {strides = array<i32>} : memref<8x32xf32, #tpu.memory_space<vmem>>, vector<8x32xf32>,
    } else {
    }
    %c0 = arith.constant 0 : index
    %c0_1 = arith.constant 0 : index
    %c0_2 = arith.constant 0 : index
    %3 = vector.load %arg2[%c0, %c0_1, %c0_2] : memref<8x8x16xbf16, #tpu.memory_space<vmem>>, vector<8x8x16xbf16>
    %4 = vector.shape_cast %3 : vector<8x8x16xbf16> to vector<64x16xbf16>
    %c0_3 = arith.constant 0 : index
    %c0_4 = arith.constant 0 : index
    %5 = vector.load %arg3[%c0_3, %c0_4] : memref<16x128xbf16, #tpu.memory_space<vmem>>, vector<16x128xbf16>
    %cst = arith.constant dense<0.000000e+00> : vector<64x128xf32>
    %6 = tpu.matmul %4, %5, %cst {dimension_numbers = #tpu.dot_dimension_numbers<[1], [0], [0], [1], [0, 0, 1, 1], [], []>} : vector<64x16xbf16>, vector<16x128xbf16>, vector<64x128xf32> -> vector<64x128xf32>
    %c0_5 = arith.constant 0 : index
    %c0_6 = arith.constant 0 : index
    %7 = vector.load %arg5[%c0_5, %c0_6] : memref<1x128xf32, #tpu.memory_space<vmem>>, vector<1x128xf32>
    %8 = vector.broadcast %7 : vector<1x128xf32> to vector<64x128xf32>
    %9 = arith.addf %6, %8 : vector<64x128xf32>
    %c0_7 = arith.constant 0 : index
    %c0_8 = arith.constant 0 : index
    %10 = vector.load %arg7[%c0_7, %c0_8] : memref<64x128xf32, #tpu.memory_space<vmem>>, vector<64x128xf32>
    tpu.vector_store %arg7[%c0_7, %c0_8], %9 {strides = array<i32>} : memref<64x128xf32, #tpu.memory_space<vmem>>, vector<64x128xf32>,
    %c0_9 = arith.constant 0 : index
    %c0_10 = arith.constant 0 : index
    %11 = vector.load %arg4[%c0_9, %c0_10] : memref<32x128xbf16, #tpu.memory_space<vmem>>, vector<32x128xbf16>
    %c0_11 = arith.constant 0 : index
    %c0_12 = arith.constant 0 : index
    %12 = vector.load %arg8[%c0_11, %c0_12] : memref<8x32xf32, #tpu.memory_space<vmem>>, vector<8x32xf32>
    %c0_13 = arith.constant 0 : index
    %c0_14 = arith.constant 0 : index
    %13 = vector.load %arg9[%c0_13, %c0_14] : memref<8x32xf32, #tpu.memory_space<vmem>>, vector<8x32xf32>
    %c0_i32_15 = arith.constant 0 : i32
    %14 = arith.truncf %12 : vector<8x32xf32> to vector<8x32xbf16>
    %c8_i32 = arith.constant 8 : i32
    %15 = arith.muli %c0_i32_15, %c8_i32 : i32
    %16 = tpu.assume_multiple %15, 8 : i32
    %cst_16 = arith.constant dense<0.000000e+00> : vector<8x128xf32>
    %17 = tpu.matmul %14, %11, %cst_16 {dimension_numbers = #tpu.dot_dimension_numbers<[1], [0], [0], [1], [0, 0, 1, 1], [], []>} : vector<8x32xbf16>, vector<32x128xbf16>, vector<8x128xf32> -> vector<8x128xf32>
    %18 = arith.index_cast %16 : i32 to index
    %c0_17 = arith.constant 0 : index
    %19 = vector.load %arg7[%18, %c0_17] : memref<64x128xf32, #tpu.memory_space<vmem>>, vector<8x128xf32>
    %20 = arith.addf %17, %19 : vector<8x128xf32>
    %21 = vector.extract_strided_slice %20 {offsets = [0, 0], sizes = [8, 32], strides = [1, 1]} : vector<8x128xf32> to vector<8x32xf32>
    %22 = arith.negf %21 : vector<8x32xf32>
    %23 = math.exp %22 : vector<8x32xf32>
    %cst_18 = arith.constant 1.000000e+00 : f32
    %24 = vector.broadcast %cst_18 : f32 to vector<8x32xf32>
    %25 = arith.addf %24, %23 : vector<8x32xf32>
    %26 = arith.divf %24, %25 : vector<8x32xf32>
    %27 = vector.extract_strided_slice %20 {offsets = [0, 32], sizes = [8, 32], strides = [1, 1]} : vector<8x128xf32> to vector<8x32xf32>
    %28 = arith.negf %27 : vector<8x32xf32>
    %29 = math.exp %28 : vector<8x32xf32>
    %cst_19 = arith.constant 1.000000e+00 : f32
    %30 = vector.broadcast %cst_19 : f32 to vector<8x32xf32>
    %31 = arith.addf %30, %29 : vector<8x32xf32>
    %32 = arith.divf %30, %31 : vector<8x32xf32>
    %33 = vector.extract_strided_slice %20 {offsets = [0, 64], sizes = [8, 32], strides = [1, 1]} : vector<8x128xf32> to vector<8x32xf32>
    %34 = math.tanh %33 : vector<8x32xf32>
    %35 = vector.extract_strided_slice %20 {offsets = [0, 96], sizes = [8, 32], strides = [1, 1]} : vector<8x128xf32> to vector<8x32xf32>
    %36 = arith.negf %35 : vector<8x32xf32>
    %37 = math.exp %36 : vector<8x32xf32>
    %cst_20 = arith.constant 1.000000e+00 : f32
    %38 = vector.broadcast %cst_20 : f32 to vector<8x32xf32>
    %39 = arith.addf %38, %37 : vector<8x32xf32>
    %40 = arith.divf %38, %39 : vector<8x32xf32>
    %41 = arith.mulf %32, %13 : vector<8x32xf32>
    %42 = arith.mulf %26, %34 : vector<8x32xf32>
    %43 = arith.addf %41, %42 : vector<8x32xf32>
    %44 = math.tanh %43 : vector<8x32xf32>
    %45 = arith.mulf %40, %44 : vector<8x32xf32>
    %46 = arith.truncf %45 : vector<8x32xf32> to vector<8x32xbf16>
    %47 = arith.index_cast %c0_i32_15 : i32 to index
    %c0_21 = arith.constant 0 : index
    %c0_22 = arith.constant 0 : index
    %48 = vector.load %arg6[%47, %c0_21, %c0_22] : memref<8x8x32xbf16, #tpu.memory_space<vmem>>, vector<1x8x32xbf16>
    %49 = vector.shape_cast %48 : vector<1x8x32xbf16> to vector<8x32xbf16>
    %50 = vector.shape_cast %46 : vector<8x32xbf16> to vector<1x8x32xbf16>
    tpu.vector_store %arg6[%47, %c0_21, %c0_22], %50 {strides = array<i32>} : memref<8x8x32xbf16, #tpu.memory_space<vmem>>, vector<1x8x32xbf16>,
    %c1_i32 = arith.constant 1 : i32
    %51 = arith.truncf %45 : vector<8x32xf32> to vector<8x32xbf16>
    %c8_i32_23 = arith.constant 8 : i32
    %52 = arith.muli %c1_i32, %c8_i32_23 : i32
    %53 = tpu.assume_multiple %52, 8 : i32
    %cst_24 = arith.constant dense<0.000000e+00> : vector<8x128xf32>
    %54 = tpu.matmul %51, %11, %cst_24 {dimension_numbers = #tpu.dot_dimension_numbers<[1], [0], [0], [1], [0, 0, 1, 1], [], []>} : vector<8x32xbf16>, vector<32x128xbf16>, vector<8x128xf32> -> vector<8x128xf32>
    %55 = arith.index_cast %53 : i32 to index
    %c0_25 = arith.constant 0 : index
    %56 = vector.load %arg7[%55, %c0_25] : memref<64x128xf32, #tpu.memory_space<vmem>>, vector<8x128xf32>
    %57 = arith.addf %54, %56 : vector<8x128xf32>
    %58 = vector.extract_strided_slice %57 {offsets = [0, 0], sizes = [8, 32], strides = [1, 1]} : vector<8x128xf32> to vector<8x32xf32>
    %59 = arith.negf %58 : vector<8x32xf32>
    %60 = math.exp %59 : vector<8x32xf32>
    %cst_26 = arith.constant 1.000000e+00 : f32
    %61 = vector.broadcast %cst_26 : f32 to vector<8x32xf32>
    %62 = arith.addf %61, %60 : vector<8x32xf32>
    %63 = arith.divf %61, %62 : vector<8x32xf32>
    %64 = vector.extract_strided_slice %57 {offsets = [0, 32], sizes = [8, 32], strides = [1, 1]} : vector<8x128xf32> to vector<8x32xf32>
    %65 = arith.negf %64 : vector<8x32xf32>
    %66 = math.exp %65 : vector<8x32xf32>
    %cst_27 = arith.constant 1.000000e+00 : f32
    %67 = vector.broadcast %cst_27 : f32 to vector<8x32xf32>
    %68 = arith.addf %67, %66 : vector<8x32xf32>
    %69 = arith.divf %67, %68 : vector<8x32xf32>
    %70 = vector.extract_strided_slice %57 {offsets = [0, 64], sizes = [8, 32], strides = [1, 1]} : vector<8x128xf32> to vector<8x32xf32>
    %71 = math.tanh %70 : vector<8x32xf32>
    %72 = vector.extract_strided_slice %57 {offsets = [0, 96], sizes = [8, 32], strides = [1, 1]} : vector<8x128xf32> to vector<8x32xf32>
    %73 = arith.negf %72 : vector<8x32xf32>
    %74 = math.exp %73 : vector<8x32xf32>
    %cst_28 = arith.constant 1.000000e+00 : f32
    %75 = vector.broadcast %cst_28 : f32 to vector<8x32xf32>
    %76 = arith.addf %75, %74 : vector<8x32xf32>
    %77 = arith.divf %75, %76 : vector<8x32xf32>
    %78 = arith.mulf %69, %43 : vector<8x32xf32>
    %79 = arith.mulf %63, %71 : vector<8x32xf32>
    %80 = arith.addf %78, %79 : vector<8x32xf32>
    %81 = math.tanh %80 : vector<8x32xf32>
    %82 = arith.mulf %77, %81 : vector<8x32xf32>
    %83 = arith.truncf %82 : vector<8x32xf32> to vector<8x32xbf16>
    %84 = arith.index_cast %c1_i32 : i32 to index
    %c0_29 = arith.constant 0 : index
    %c0_30 = arith.constant 0 : index
    %85 = vector.load %arg6[%84, %c0_29, %c0_30] : memref<8x8x32xbf16, #tpu.memory_space<vmem>>, vector<1x8x32xbf16>
    %86 = vector.shape_cast %85 : vector<1x8x32xbf16> to vector<8x32xbf16>
    %87 = vector.shape_cast %83 : vector<8x32xbf16> to vector<1x8x32xbf16>
    tpu.vector_store %arg6[%84, %c0_29, %c0_30], %87 {strides = array<i32>} : memref<8x8x32xbf16, #tpu.memory_space<vmem>>, vector<1x8x32xbf16>,
    %c2_i32 = arith.constant 2 : i32
    %88 = arith.truncf %82 : vector<8x32xf32> to vector<8x32xbf16>
    %c8_i32_31 = arith.constant 8 : i32
    %89 = arith.muli %c2_i32, %c8_i32_31 : i32
    %90 = tpu.assume_multiple %89, 8 : i32
    %cst_32 = arith.constant dense<0.000000e+00> : vector<8x128xf32>
    %91 = tpu.matmul %88, %11, %cst_32 {dimension_numbers = #tpu.dot_dimension_numbers<[1], [0], [0], [1], [0, 0, 1, 1], [], []>} : vector<8x32xbf16>, vector<32x128xbf16>, vector<8x128xf32> -> vector<8x128xf32>
    %92 = arith.index_cast %90 : i32 to index
    %c0_33 = arith.constant 0 : index
    %93 = vector.load %arg7[%92, %c0_33] : memref<64x128xf32, #tpu.memory_space<vmem>>, vector<8x128xf32>
    %94 = arith.addf %91, %93 : vector<8x128xf32>
    %95 = vector.extract_strided_slice %94 {offsets = [0, 0], sizes = [8, 32], strides = [1, 1]} : vector<8x128xf32> to vector<8x32xf32>
    %96 = arith.negf %95 : vector<8x32xf32>
    %97 = math.exp %96 : vector<8x32xf32>
    %cst_34 = arith.constant 1.000000e+00 : f32
    %98 = vector.broadcast %cst_34 : f32 to vector<8x32xf32>
    %99 = arith.addf %98, %97 : vector<8x32xf32>
    %100 = arith.divf %98, %99 : vector<8x32xf32>
    %101 = vector.extract_strided_slice %94 {offsets = [0, 32], sizes = [8, 32], strides = [1, 1]} : vector<8x128xf32> to vector<8x32xf32>
    %102 = arith.negf %101 : vector<8x32xf32>
    %103 = math.exp %102 : vector<8x32xf32>
    %cst_35 = arith.constant 1.000000e+00 : f32
    %104 = vector.broadcast %cst_35 : f32 to vector<8x32xf32>
    %105 = arith.addf %104, %103 : vector<8x32xf32>
    %106 = arith.divf %104, %105 : vector<8x32xf32>
    %107 = vector.extract_strided_slice %94 {offsets = [0, 64], sizes = [8, 32], strides = [1, 1]} : vector<8x128xf32> to vector<8x32xf32>
    %108 = math.tanh %107 : vector<8x32xf32>
    %109 = vector.extract_strided_slice %94 {offsets = [0, 96], sizes = [8, 32], strides = [1, 1]} : vector<8x128xf32> to vector<8x32xf32>
    %110 = arith.negf %109 : vector<8x32xf32>
    %111 = math.exp %110 : vector<8x32xf32>
    %cst_36 = arith.constant 1.000000e+00 : f32
    %112 = vector.broadcast %cst_36 : f32 to vector<8x32xf32>
    %113 = arith.addf %112, %111 : vector<8x32xf32>
    %114 = arith.divf %112, %113 : vector<8x32xf32>
    %115 = arith.mulf %106, %80 : vector<8x32xf32>
    %116 = arith.mulf %100, %108 : vector<8x32xf32>
    %117 = arith.addf %115, %116 : vector<8x32xf32>
    %118 = math.tanh %117 : vector<8x32xf32>
    %119 = arith.mulf %114, %118 : vector<8x32xf32>
    %120 = arith.truncf %119 : vector<8x32xf32> to vector<8x32xbf16>
    %121 = arith.index_cast %c2_i32 : i32 to index
    %c0_37 = arith.constant 0 : index
    %c0_38 = arith.constant 0 : index
    %122 = vector.load %arg6[%121, %c0_37, %c0_38] : memref<8x8x32xbf16, #tpu.memory_space<vmem>>, vector<1x8x32xbf16>
    %123 = vector.shape_cast %122 : vector<1x8x32xbf16> to vector<8x32xbf16>
    %124 = vector.shape_cast %120 : vector<8x32xbf16> to vector<1x8x32xbf16>
    tpu.vector_store %arg6[%121, %c0_37, %c0_38], %124 {strides = array<i32>} : memref<8x8x32xbf16, #tpu.memory_space<vmem>>, vector<1x8x32xbf16>,
    %c3_i32 = arith.constant 3 : i32
    %125 = arith.truncf %119 : vector<8x32xf32> to vector<8x32xbf16>
    %c8_i32_39 = arith.constant 8 : i32
    %126 = arith.muli %c3_i32, %c8_i32_39 : i32
    %127 = tpu.assume_multiple %126, 8 : i32
    %cst_40 = arith.constant dense<0.000000e+00> : vector<8x128xf32>
    %128 = tpu.matmul %125, %11, %cst_40 {dimension_numbers = #tpu.dot_dimension_numbers<[1], [0], [0], [1], [0, 0, 1, 1], [], []>} : vector<8x32xbf16>, vector<32x128xbf16>, vector<8x128xf32> -> vector<8x128xf32>
    %129 = arith.index_cast %127 : i32 to index
    %c0_41 = arith.constant 0 : index
    %130 = vector.load %arg7[%129, %c0_41] : memref<64x128xf32, #tpu.memory_space<vmem>>, vector<8x128xf32>
    %131 = arith.addf %128, %130 : vector<8x128xf32>
    %132 = vector.extract_strided_slice %131 {offsets = [0, 0], sizes = [8, 32], strides = [1, 1]} : vector<8x128xf32> to vector<8x32xf32>
    %133 = arith.negf %132 : vector<8x32xf32>
    %134 = math.exp %133 : vector<8x32xf32>
    %cst_42 = arith.constant 1.000000e+00 : f32
    %135 = vector.broadcast %cst_42 : f32 to vector<8x32xf32>
    %136 = arith.addf %135, %134 : vector<8x32xf32>
    %137 = arith.divf %135, %136 : vector<8x32xf32>
    %138 = vector.extract_strided_slice %131 {offsets = [0, 32], sizes = [8, 32], strides = [1, 1]} : vector<8x128xf32> to vector<8x32xf32>
    %139 = arith.negf %138 : vector<8x32xf32>
    %140 = math.exp %139 : vector<8x32xf32>
    %cst_43 = arith.constant 1.000000e+00 : f32
    %141 = vector.broadcast %cst_43 : f32 to vector<8x32xf32>
    %142 = arith.addf %141, %140 : vector<8x32xf32>
    %143 = arith.divf %141, %142 : vector<8x32xf32>
    %144 = vector.extract_strided_slice %131 {offsets = [0, 64], sizes = [8, 32], strides = [1, 1]} : vector<8x128xf32> to vector<8x32xf32>
    %145 = math.tanh %144 : vector<8x32xf32>
    %146 = vector.extract_strided_slice %131 {offsets = [0, 96], sizes = [8, 32], strides = [1, 1]} : vector<8x128xf32> to vector<8x32xf32>
    %147 = arith.negf %146 : vector<8x32xf32>
    %148 = math.exp %147 : vector<8x32xf32>
    %cst_44 = arith.constant 1.000000e+00 : f32
    %149 = vector.broadcast %cst_44 : f32 to vector<8x32xf32>
    %150 = arith.addf %149, %148 : vector<8x32xf32>
    %151 = arith.divf %149, %150 : vector<8x32xf32>
    %152 = arith.mulf %143, %117 : vector<8x32xf32>
    %153 = arith.mulf %137, %145 : vector<8x32xf32>
    %154 = arith.addf %152, %153 : vector<8x32xf32>
    %155 = math.tanh %154 : vector<8x32xf32>
    %156 = arith.mulf %151, %155 : vector<8x32xf32>
    %157 = arith.truncf %156 : vector<8x32xf32> to vector<8x32xbf16>
    %158 = arith.index_cast %c3_i32 : i32 to index
    %c0_45 = arith.constant 0 : index
    %c0_46 = arith.constant 0 : index
    %159 = vector.load %arg6[%158, %c0_45, %c0_46] : memref<8x8x32xbf16, #tpu.memory_space<vmem>>, vector<1x8x32xbf16>
    %160 = vector.shape_cast %159 : vector<1x8x32xbf16> to vector<8x32xbf16>
    %161 = vector.shape_cast %157 : vector<8x32xbf16> to vector<1x8x32xbf16>
    tpu.vector_store %arg6[%158, %c0_45, %c0_46], %161 {strides = array<i32>} : memref<8x8x32xbf16, #tpu.memory_space<vmem>>, vector<1x8x32xbf16>,
    %c4_i32 = arith.constant 4 : i32
    %162 = arith.truncf %156 : vector<8x32xf32> to vector<8x32xbf16>
    %c8_i32_47 = arith.constant 8 : i32
    %163 = arith.muli %c4_i32, %c8_i32_47 : i32
    %164 = tpu.assume_multiple %163, 8 : i32
    %cst_48 = arith.constant dense<0.000000e+00> : vector<8x128xf32>
    %165 = tpu.matmul %162, %11, %cst_48 {dimension_numbers = #tpu.dot_dimension_numbers<[1], [0], [0], [1], [0, 0, 1, 1], [], []>} : vector<8x32xbf16>, vector<32x128xbf16>, vector<8x128xf32> -> vector<8x128xf32>
    %166 = arith.index_cast %164 : i32 to index
    %c0_49 = arith.constant 0 : index
    %167 = vector.load %arg7[%166, %c0_49] : memref<64x128xf32, #tpu.memory_space<vmem>>, vector<8x128xf32>
    %168 = arith.addf %165, %167 : vector<8x128xf32>
    %169 = vector.extract_strided_slice %168 {offsets = [0, 0], sizes = [8, 32], strides = [1, 1]} : vector<8x128xf32> to vector<8x32xf32>
    %170 = arith.negf %169 : vector<8x32xf32>
    %171 = math.exp %170 : vector<8x32xf32>
    %cst_50 = arith.constant 1.000000e+00 : f32
    %172 = vector.broadcast %cst_50 : f32 to vector<8x32xf32>
    %173 = arith.addf %172, %171 : vector<8x32xf32>
    %174 = arith.divf %172, %173 : vector<8x32xf32>
    %175 = vector.extract_strided_slice %168 {offsets = [0, 32], sizes = [8, 32], strides = [1, 1]} : vector<8x128xf32> to vector<8x32xf32>
    %176 = arith.negf %175 : vector<8x32xf32>
    %177 = math.exp %176 : vector<8x32xf32>
    %cst_51 = arith.constant 1.000000e+00 : f32
    %178 = vector.broadcast %cst_51 : f32 to vector<8x32xf32>
    %179 = arith.addf %178, %177 : vector<8x32xf32>
    %180 = arith.divf %178, %179 : vector<8x32xf32>
    %181 = vector.extract_strided_slice %168 {offsets = [0, 64], sizes = [8, 32], strides = [1, 1]} : vector<8x128xf32> to vector<8x32xf32>
    %182 = math.tanh %181 : vector<8x32xf32>
    %183 = vector.extract_strided_slice %168 {offsets = [0, 96], sizes = [8, 32], strides = [1, 1]} : vector<8x128xf32> to vector<8x32xf32>
    %184 = arith.negf %183 : vector<8x32xf32>
    %185 = math.exp %184 : vector<8x32xf32>
    %cst_52 = arith.constant 1.000000e+00 : f32
    %186 = vector.broadcast %cst_52 : f32 to vector<8x32xf32>
    %187 = arith.addf %186, %185 : vector<8x32xf32>
    %188 = arith.divf %186, %187 : vector<8x32xf32>
    %189 = arith.mulf %180, %154 : vector<8x32xf32>
    %190 = arith.mulf %174, %182 : vector<8x32xf32>
    %191 = arith.addf %189, %190 : vector<8x32xf32>
    %192 = math.tanh %191 : vector<8x32xf32>
    %193 = arith.mulf %188, %192 : vector<8x32xf32>
    %194 = arith.truncf %193 : vector<8x32xf32> to vector<8x32xbf16>
    %195 = arith.index_cast %c4_i32 : i32 to index
    %c0_53 = arith.constant 0 : index
    %c0_54 = arith.constant 0 : index
    %196 = vector.load %arg6[%195, %c0_53, %c0_54] : memref<8x8x32xbf16, #tpu.memory_space<vmem>>, vector<1x8x32xbf16>
    %197 = vector.shape_cast %196 : vector<1x8x32xbf16> to vector<8x32xbf16>
    %198 = vector.shape_cast %194 : vector<8x32xbf16> to vector<1x8x32xbf16>
    tpu.vector_store %arg6[%195, %c0_53, %c0_54], %198 {strides = array<i32>} : memref<8x8x32xbf16, #tpu.memory_space<vmem>>, vector<1x8x32xbf16>,
    %c5_i32 = arith.constant 5 : i32
    %199 = arith.truncf %193 : vector<8x32xf32> to vector<8x32xbf16>
    %c8_i32_55 = arith.constant 8 : i32
    %200 = arith.muli %c5_i32, %c8_i32_55 : i32
    %201 = tpu.assume_multiple %200, 8 : i32
    %cst_56 = arith.constant dense<0.000000e+00> : vector<8x128xf32>
    %202 = tpu.matmul %199, %11, %cst_56 {dimension_numbers = #tpu.dot_dimension_numbers<[1], [0], [0], [1], [0, 0, 1, 1], [], []>} : vector<8x32xbf16>, vector<32x128xbf16>, vector<8x128xf32> -> vector<8x128xf32>
    %203 = arith.index_cast %201 : i32 to index
    %c0_57 = arith.constant 0 : index
    %204 = vector.load %arg7[%203, %c0_57] : memref<64x128xf32, #tpu.memory_space<vmem>>, vector<8x128xf32>
    %205 = arith.addf %202, %204 : vector<8x128xf32>
    %206 = vector.extract_strided_slice %205 {offsets = [0, 0], sizes = [8, 32], strides = [1, 1]} : vector<8x128xf32> to vector<8x32xf32>
    %207 = arith.negf %206 : vector<8x32xf32>
    %208 = math.exp %207 : vector<8x32xf32>
    %cst_58 = arith.constant 1.000000e+00 : f32
    %209 = vector.broadcast %cst_58 : f32 to vector<8x32xf32>
    %210 = arith.addf %209, %208 : vector<8x32xf32>
    %211 = arith.divf %209, %210 : vector<8x32xf32>
    %212 = vector.extract_strided_slice %205 {offsets = [0, 32], sizes = [8, 32], strides = [1, 1]} : vector<8x128xf32> to vector<8x32xf32>
    %213 = arith.negf %212 : vector<8x32xf32>
    %214 = math.exp %213 : vector<8x32xf32>
    %cst_59 = arith.constant 1.000000e+00 : f32
    %215 = vector.broadcast %cst_59 : f32 to vector<8x32xf32>
    %216 = arith.addf %215, %214 : vector<8x32xf32>
    %217 = arith.divf %215, %216 : vector<8x32xf32>
    %218 = vector.extract_strided_slice %205 {offsets = [0, 64], sizes = [8, 32], strides = [1, 1]} : vector<8x128xf32> to vector<8x32xf32>
    %219 = math.tanh %218 : vector<8x32xf32>
    %220 = vector.extract_strided_slice %205 {offsets = [0, 96], sizes = [8, 32], strides = [1, 1]} : vector<8x128xf32> to vector<8x32xf32>
    %221 = arith.negf %220 : vector<8x32xf32>
    %222 = math.exp %221 : vector<8x32xf32>
    %cst_60 = arith.constant 1.000000e+00 : f32
    %223 = vector.broadcast %cst_60 : f32 to vector<8x32xf32>
    %224 = arith.addf %223, %222 : vector<8x32xf32>
    %225 = arith.divf %223, %224 : vector<8x32xf32>
    %226 = arith.mulf %217, %191 : vector<8x32xf32>
    %227 = arith.mulf %211, %219 : vector<8x32xf32>
    %228 = arith.addf %226, %227 : vector<8x32xf32>
    %229 = math.tanh %228 : vector<8x32xf32>
    %230 = arith.mulf %225, %229 : vector<8x32xf32>
    %231 = arith.truncf %230 : vector<8x32xf32> to vector<8x32xbf16>
    %232 = arith.index_cast %c5_i32 : i32 to index
    %c0_61 = arith.constant 0 : index
    %c0_62 = arith.constant 0 : index
    %233 = vector.load %arg6[%232, %c0_61, %c0_62] : memref<8x8x32xbf16, #tpu.memory_space<vmem>>, vector<1x8x32xbf16>
    %234 = vector.shape_cast %233 : vector<1x8x32xbf16> to vector<8x32xbf16>
    %235 = vector.shape_cast %231 : vector<8x32xbf16> to vector<1x8x32xbf16>
    tpu.vector_store %arg6[%232, %c0_61, %c0_62], %235 {strides = array<i32>} : memref<8x8x32xbf16, #tpu.memory_space<vmem>>, vector<1x8x32xbf16>,
    %c6_i32 = arith.constant 6 : i32
    %236 = arith.truncf %230 : vector<8x32xf32> to vector<8x32xbf16>
    %c8_i32_63 = arith.constant 8 : i32
    %237 = arith.muli %c6_i32, %c8_i32_63 : i32
    %238 = tpu.assume_multiple %237, 8 : i32
    %cst_64 = arith.constant dense<0.000000e+00> : vector<8x128xf32>
    %239 = tpu.matmul %236, %11, %cst_64 {dimension_numbers = #tpu.dot_dimension_numbers<[1], [0], [0], [1], [0, 0, 1, 1], [], []>} : vector<8x32xbf16>, vector<32x128xbf16>, vector<8x128xf32> -> vector<8x128xf32>
    %240 = arith.index_cast %238 : i32 to index
    %c0_65 = arith.constant 0 : index
    %241 = vector.load %arg7[%240, %c0_65] : memref<64x128xf32, #tpu.memory_space<vmem>>, vector<8x128xf32>
    %242 = arith.addf %239, %241 : vector<8x128xf32>
    %243 = vector.extract_strided_slice %242 {offsets = [0, 0], sizes = [8, 32], strides = [1, 1]} : vector<8x128xf32> to vector<8x32xf32>
    %244 = arith.negf %243 : vector<8x32xf32>
    %245 = math.exp %244 : vector<8x32xf32>
    %cst_66 = arith.constant 1.000000e+00 : f32
    %246 = vector.broadcast %cst_66 : f32 to vector<8x32xf32>
    %247 = arith.addf %246, %245 : vector<8x32xf32>
    %248 = arith.divf %246, %247 : vector<8x32xf32>
    %249 = vector.extract_strided_slice %242 {offsets = [0, 32], sizes = [8, 32], strides = [1, 1]} : vector<8x128xf32> to vector<8x32xf32>
    %250 = arith.negf %249 : vector<8x32xf32>
    %251 = math.exp %250 : vector<8x32xf32>
    %cst_67 = arith.constant 1.000000e+00 : f32
    %252 = vector.broadcast %cst_67 : f32 to vector<8x32xf32>
    %253 = arith.addf %252, %251 : vector<8x32xf32>
    %254 = arith.divf %252, %253 : vector<8x32xf32>
    %255 = vector.extract_strided_slice %242 {offsets = [0, 64], sizes = [8, 32], strides = [1, 1]} : vector<8x128xf32> to vector<8x32xf32>
    %256 = math.tanh %255 : vector<8x32xf32>
    %257 = vector.extract_strided_slice %242 {offsets = [0, 96], sizes = [8, 32], strides = [1, 1]} : vector<8x128xf32> to vector<8x32xf32>
    %258 = arith.negf %257 : vector<8x32xf32>
    %259 = math.exp %258 : vector<8x32xf32>
    %cst_68 = arith.constant 1.000000e+00 : f32
    %260 = vector.broadcast %cst_68 : f32 to vector<8x32xf32>
    %261 = arith.addf %260, %259 : vector<8x32xf32>
    %262 = arith.divf %260, %261 : vector<8x32xf32>
    %263 = arith.mulf %254, %228 : vector<8x32xf32>
    %264 = arith.mulf %248, %256 : vector<8x32xf32>
    %265 = arith.addf %263, %264 : vector<8x32xf32>
    %266 = math.tanh %265 : vector<8x32xf32>
    %267 = arith.mulf %262, %266 : vector<8x32xf32>
    %268 = arith.truncf %267 : vector<8x32xf32> to vector<8x32xbf16>
    %269 = arith.index_cast %c6_i32 : i32 to index
    %c0_69 = arith.constant 0 : index
    %c0_70 = arith.constant 0 : index
    %270 = vector.load %arg6[%269, %c0_69, %c0_70] : memref<8x8x32xbf16, #tpu.memory_space<vmem>>, vector<1x8x32xbf16>
    %271 = vector.shape_cast %270 : vector<1x8x32xbf16> to vector<8x32xbf16>
    %272 = vector.shape_cast %268 : vector<8x32xbf16> to vector<1x8x32xbf16>
    tpu.vector_store %arg6[%269, %c0_69, %c0_70], %272 {strides = array<i32>} : memref<8x8x32xbf16, #tpu.memory_space<vmem>>, vector<1x8x32xbf16>,
    %c7_i32 = arith.constant 7 : i32
    %273 = arith.truncf %267 : vector<8x32xf32> to vector<8x32xbf16>
    %c8_i32_71 = arith.constant 8 : i32
    %274 = arith.muli %c7_i32, %c8_i32_71 : i32
    %275 = tpu.assume_multiple %274, 8 : i32
    %cst_72 = arith.constant dense<0.000000e+00> : vector<8x128xf32>
    %276 = tpu.matmul %273, %11, %cst_72 {dimension_numbers = #tpu.dot_dimension_numbers<[1], [0], [0], [1], [0, 0, 1, 1], [], []>} : vector<8x32xbf16>, vector<32x128xbf16>, vector<8x128xf32> -> vector<8x128xf32>
    %277 = arith.index_cast %275 : i32 to index
    %c0_73 = arith.constant 0 : index
    %278 = vector.load %arg7[%277, %c0_73] : memref<64x128xf32, #tpu.memory_space<vmem>>, vector<8x128xf32>
    %279 = arith.addf %276, %278 : vector<8x128xf32>
    %280 = vector.extract_strided_slice %279 {offsets = [0, 0], sizes = [8, 32], strides = [1, 1]} : vector<8x128xf32> to vector<8x32xf32>
    %281 = arith.negf %280 : vector<8x32xf32>
    %282 = math.exp %281 : vector<8x32xf32>
    %cst_74 = arith.constant 1.000000e+00 : f32
    %283 = vector.broadcast %cst_74 : f32 to vector<8x32xf32>
    %284 = arith.addf %283, %282 : vector<8x32xf32>
    %285 = arith.divf %283, %284 : vector<8x32xf32>
    %286 = vector.extract_strided_slice %279 {offsets = [0, 32], sizes = [8, 32], strides = [1, 1]} : vector<8x128xf32> to vector<8x32xf32>
    %287 = arith.negf %286 : vector<8x32xf32>
    %288 = math.exp %287 : vector<8x32xf32>
    %cst_75 = arith.constant 1.000000e+00 : f32
    %289 = vector.broadcast %cst_75 : f32 to vector<8x32xf32>
    %290 = arith.addf %289, %288 : vector<8x32xf32>
    %291 = arith.divf %289, %290 : vector<8x32xf32>
    %292 = vector.extract_strided_slice %279 {offsets = [0, 64], sizes = [8, 32], strides = [1, 1]} : vector<8x128xf32> to vector<8x32xf32>
    %293 = math.tanh %292 : vector<8x32xf32>
    %294 = vector.extract_strided_slice %279 {offsets = [0, 96], sizes = [8, 32], strides = [1, 1]} : vector<8x128xf32> to vector<8x32xf32>
    %295 = arith.negf %294 : vector<8x32xf32>
    %296 = math.exp %295 : vector<8x32xf32>
    %cst_76 = arith.constant 1.000000e+00 : f32
    %297 = vector.broadcast %cst_76 : f32 to vector<8x32xf32>
    %298 = arith.addf %297, %296 : vector<8x32xf32>
    %299 = arith.divf %297, %298 : vector<8x32xf32>
    %300 = arith.mulf %291, %265 : vector<8x32xf32>
    %301 = arith.mulf %285, %293 : vector<8x32xf32>
    %302 = arith.addf %300, %301 : vector<8x32xf32>
    %303 = math.tanh %302 : vector<8x32xf32>
    %304 = arith.mulf %299, %303 : vector<8x32xf32>
    %305 = arith.truncf %304 : vector<8x32xf32> to vector<8x32xbf16>
    %306 = arith.index_cast %c7_i32 : i32 to index
    %c0_77 = arith.constant 0 : index
    %c0_78 = arith.constant 0 : index
    %307 = vector.load %arg6[%306, %c0_77, %c0_78] : memref<8x8x32xbf16, #tpu.memory_space<vmem>>, vector<1x8x32xbf16>
    %308 = vector.shape_cast %307 : vector<1x8x32xbf16> to vector<8x32xbf16>
    %309 = vector.shape_cast %305 : vector<8x32xbf16> to vector<1x8x32xbf16>
    tpu.vector_store %arg6[%306, %c0_77, %c0_78], %309 {strides = array<i32>} : memref<8x8x32xbf16, #tpu.memory_space<vmem>>, vector<1x8x32xbf16>,
    %c8_i32_79 = arith.constant 8 : i32
    %c0_80 = arith.constant 0 : index
    %c0_81 = arith.constant 0 : index
    %310 = vector.load %arg8[%c0_80, %c0_81] : memref<8x32xf32, #tpu.memory_space<vmem>>, vector<8x32xf32>
    tpu.vector_store %arg8[%c0_80, %c0_81], %304 {strides = array<i32>} : memref<8x32xf32, #tpu.memory_space<vmem>>, vector<8x32xf32>,
    %c0_82 = arith.constant 0 : index
    %c0_83 = arith.constant 0 : index
    %311 = vector.load %arg9[%c0_82, %c0_83] : memref<8x32xf32, #tpu.memory_space<vmem>>, vector<8x32xf32>
    tpu.vector_store %arg9[%c0_82, %c0_83], %302 {strides = array<i32>} : memref<8x32xf32, #tpu.memory_space<vmem>>, vector<8x32xf32>,
    return
  }
  func.func @transform_0(%arg0: i32, %arg1: i32) -> (i32, i32, i32) {
    %c0_i32 = arith.constant 0 : i32
    %c0_i32_0 = arith.constant 0 : i32
    return %arg1, %arg0, %c0_i32 : i32, i32, i32
  }
  func.func @transform_1(%arg0: i32, %arg1: i32) -> (i32, i32) {
    %c0_i32 = arith.constant 0 : i32
    %c0_i32_0 = arith.constant 0 : i32
    %c0_i32_1 = arith.constant 0 : i32
    return %c0_i32, %c0_i32_0 : i32, i32
  }
  func.func @transform_2(%arg0: i32, %arg1: i32) -> (i32, i32) {
    %c0_i32 = arith.constant 0 : i32
    %c0_i32_0 = arith.constant 0 : i32
    %c0_i32_1 = arith.constant 0 : i32
    return %c0_i32, %c0_i32_0 : i32, i32
  }
  func.func @transform_3(%arg0: i32, %arg1: i32) -> (i32, i32) {
    %c0_i32 = arith.constant 0 : i32
    %c0_i32_0 = arith.constant 0 : i32
    %c0_i32_1 = arith.constant 0 : i32
    return %c0_i32, %c0_i32_0 : i32, i32
  }
  func.func @transform_4(%arg0: i32, %arg1: i32) -> (i32, i32, i32) {
    %c0_i32 = arith.constant 0 : i32
    %c0_i32_0 = arith.constant 0 : i32
    return %arg1, %arg0, %c0_i32 : i32, i32, i32
  }
}

module attributes {stable_mosaic.version = 11 : i64} {
  func.func @kernel(%arg0: i32, %arg1: i32, %arg2: memref<8x8x32xbf16, #tpu.memory_space<vmem>>, %arg3: memref<32x128xbf16, #tpu.memory_space<vmem>>, %arg4: memref<32x128xbf16, #tpu.memory_space<vmem>>, %arg5: memref<1x128xf32, #tpu.memory_space<vmem>>, %arg6: memref<32x4xbf16, #tpu.memory_space<vmem>>, %arg7: memref<1x4xf32, #tpu.memory_space<vmem>>, %arg8: memref<8x4xf32, #tpu.memory_space<vmem>>, %arg9: memref<64x128xf32, #tpu.memory_space<vmem>>, %arg10: memref<8x32xf32, #tpu.memory_space<vmem>>, %arg11: memref<8x32xf32, #tpu.memory_space<vmem>>) attributes {dimension_semantics = [#tpu.dimension_semantics<parallel>, #tpu.dimension_semantics<arbitrary>], iteration_bounds = array<i64: 1, 1>, scalar_prefetch = 0 : i64, scratch_operands = 3 : i64, tpu.core_type = #tpu.core_type<tc>, window_params = [{transform_indices = @transform_0, window_bounds = array<i64: 8, 8, 32>}, {pipeline_mode = #tpu.pipeline_mode<synchronous>, transform_indices = @transform_1, window_bounds = array<i64: 32, 128>}, {pipeline_mode = #tpu.pipeline_mode<synchronous>, transform_indices = @transform_2, window_bounds = array<i64: 32, 128>}, {pipeline_mode = #tpu.pipeline_mode<synchronous>, transform_indices = @transform_3, window_bounds = array<i64: 1, 128>}, {pipeline_mode = #tpu.pipeline_mode<synchronous>, transform_indices = @transform_4, window_bounds = array<i64: 32, 4>}, {pipeline_mode = #tpu.pipeline_mode<synchronous>, transform_indices = @transform_5, window_bounds = array<i64: 1, 4>}, {transform_indices = @transform_6, window_bounds = array<i64: 8, 4>}]} {
    %c0_i32 = arith.constant 0 : i32
    %0 = arith.cmpi eq, %arg1, %c0_i32 : i32
    %1 = arith.extui %0 : i1 to i32
    %c0_i32_0 = arith.constant 0 : i32
    %2 = arith.cmpi ne, %1, %c0_i32_0 : i32
    scf.if %2 {
      %cst_70 = arith.constant 0.000000e+00 : f32
      %275 = vector.broadcast %cst_70 : f32 to vector<8x32xf32>
      %c0_71 = arith.constant 0 : index
      %c0_72 = arith.constant 0 : index
      %276 = vector.load %arg10[%c0_71, %c0_72] : memref<8x32xf32, #tpu.memory_space<vmem>>, vector<8x32xf32>
      tpu.vector_store %arg10[%c0_71, %c0_72], %275 {strides = array<i32>} : memref<8x32xf32, #tpu.memory_space<vmem>>, vector<8x32xf32>,
      %cst_73 = arith.constant 0.000000e+00 : f32
      %277 = vector.broadcast %cst_73 : f32 to vector<8x32xf32>
      %c0_74 = arith.constant 0 : index
      %c0_75 = arith.constant 0 : index
      %278 = vector.load %arg11[%c0_74, %c0_75] : memref<8x32xf32, #tpu.memory_space<vmem>>, vector<8x32xf32>
      tpu.vector_store %arg11[%c0_74, %c0_75], %277 {strides = array<i32>} : memref<8x32xf32, #tpu.memory_space<vmem>>, vector<8x32xf32>,
    } else {
    }
    %c0 = arith.constant 0 : index
    %c0_1 = arith.constant 0 : index
    %c0_2 = arith.constant 0 : index
    %3 = vector.load %arg2[%c0, %c0_1, %c0_2] : memref<8x8x32xbf16, #tpu.memory_space<vmem>>, vector<8x8x32xbf16>
    %4 = vector.shape_cast %3 : vector<8x8x32xbf16> to vector<64x32xbf16>
    %c0_3 = arith.constant 0 : index
    %c0_4 = arith.constant 0 : index
    %5 = vector.load %arg3[%c0_3, %c0_4] : memref<32x128xbf16, #tpu.memory_space<vmem>>, vector<32x128xbf16>
    %cst = arith.constant dense<0.000000e+00> : vector<64x128xf32>
    %6 = tpu.matmul %4, %5, %cst {dimension_numbers = #tpu.dot_dimension_numbers<[1], [0], [0], [1], [0, 0, 1, 1], [], []>} : vector<64x32xbf16>, vector<32x128xbf16>, vector<64x128xf32> -> vector<64x128xf32>
    %c0_5 = arith.constant 0 : index
    %c0_6 = arith.constant 0 : index
    %7 = vector.load %arg5[%c0_5, %c0_6] : memref<1x128xf32, #tpu.memory_space<vmem>>, vector<1x128xf32>
    %8 = vector.broadcast %7 : vector<1x128xf32> to vector<64x128xf32>
    %9 = arith.addf %6, %8 : vector<64x128xf32>
    %c0_7 = arith.constant 0 : index
    %c0_8 = arith.constant 0 : index
    %10 = vector.load %arg9[%c0_7, %c0_8] : memref<64x128xf32, #tpu.memory_space<vmem>>, vector<64x128xf32>
    tpu.vector_store %arg9[%c0_7, %c0_8], %9 {strides = array<i32>} : memref<64x128xf32, #tpu.memory_space<vmem>>, vector<64x128xf32>,
    %c0_9 = arith.constant 0 : index
    %c0_10 = arith.constant 0 : index
    %11 = vector.load %arg4[%c0_9, %c0_10] : memref<32x128xbf16, #tpu.memory_space<vmem>>, vector<32x128xbf16>
    %c0_11 = arith.constant 0 : index
    %c0_12 = arith.constant 0 : index
    %12 = vector.load %arg10[%c0_11, %c0_12] : memref<8x32xf32, #tpu.memory_space<vmem>>, vector<8x32xf32>
    %c0_13 = arith.constant 0 : index
    %c0_14 = arith.constant 0 : index
    %13 = vector.load %arg11[%c0_13, %c0_14] : memref<8x32xf32, #tpu.memory_space<vmem>>, vector<8x32xf32>
    %c0_i32_15 = arith.constant 0 : i32
    %14 = arith.truncf %12 : vector<8x32xf32> to vector<8x32xbf16>
    %c8_i32 = arith.constant 8 : i32
    %15 = arith.muli %c0_i32_15, %c8_i32 : i32
    %16 = tpu.assume_multiple %15, 8 : i32
    %cst_16 = arith.constant dense<0.000000e+00> : vector<8x128xf32>
    %17 = tpu.matmul %14, %11, %cst_16 {dimension_numbers = #tpu.dot_dimension_numbers<[1], [0], [0], [1], [0, 0, 1, 1], [], []>} : vector<8x32xbf16>, vector<32x128xbf16>, vector<8x128xf32> -> vector<8x128xf32>
    %18 = arith.index_cast %16 : i32 to index
    %c0_17 = arith.constant 0 : index
    %19 = vector.load %arg9[%18, %c0_17] : memref<64x128xf32, #tpu.memory_space<vmem>>, vector<8x128xf32>
    %20 = arith.addf %17, %19 : vector<8x128xf32>
    %21 = vector.extract_strided_slice %20 {offsets = [0, 0], sizes = [8, 32], strides = [1, 1]} : vector<8x128xf32> to vector<8x32xf32>
    %22 = arith.negf %21 : vector<8x32xf32>
    %23 = math.exp %22 : vector<8x32xf32>
    %cst_18 = arith.constant 1.000000e+00 : f32
    %24 = vector.broadcast %cst_18 : f32 to vector<8x32xf32>
    %25 = arith.addf %24, %23 : vector<8x32xf32>
    %26 = arith.divf %24, %25 : vector<8x32xf32>
    %27 = vector.extract_strided_slice %20 {offsets = [0, 32], sizes = [8, 32], strides = [1, 1]} : vector<8x128xf32> to vector<8x32xf32>
    %28 = arith.negf %27 : vector<8x32xf32>
    %29 = math.exp %28 : vector<8x32xf32>
    %cst_19 = arith.constant 1.000000e+00 : f32
    %30 = vector.broadcast %cst_19 : f32 to vector<8x32xf32>
    %31 = arith.addf %30, %29 : vector<8x32xf32>
    %32 = arith.divf %30, %31 : vector<8x32xf32>
    %33 = vector.extract_strided_slice %20 {offsets = [0, 64], sizes = [8, 32], strides = [1, 1]} : vector<8x128xf32> to vector<8x32xf32>
    %34 = math.tanh %33 : vector<8x32xf32>
    %35 = vector.extract_strided_slice %20 {offsets = [0, 96], sizes = [8, 32], strides = [1, 1]} : vector<8x128xf32> to vector<8x32xf32>
    %36 = arith.negf %35 : vector<8x32xf32>
    %37 = math.exp %36 : vector<8x32xf32>
    %cst_20 = arith.constant 1.000000e+00 : f32
    %38 = vector.broadcast %cst_20 : f32 to vector<8x32xf32>
    %39 = arith.addf %38, %37 : vector<8x32xf32>
    %40 = arith.divf %38, %39 : vector<8x32xf32>
    %41 = arith.mulf %32, %13 : vector<8x32xf32>
    %42 = arith.mulf %26, %34 : vector<8x32xf32>
    %43 = arith.addf %41, %42 : vector<8x32xf32>
    %44 = math.tanh %43 : vector<8x32xf32>
    %45 = arith.mulf %40, %44 : vector<8x32xf32>
    %c1_i32 = arith.constant 1 : i32
    %46 = arith.truncf %45 : vector<8x32xf32> to vector<8x32xbf16>
    %c8_i32_21 = arith.constant 8 : i32
    %47 = arith.muli %c1_i32, %c8_i32_21 : i32
    %48 = tpu.assume_multiple %47, 8 : i32
    %cst_22 = arith.constant dense<0.000000e+00> : vector<8x128xf32>
    %49 = tpu.matmul %46, %11, %cst_22 {dimension_numbers = #tpu.dot_dimension_numbers<[1], [0], [0], [1], [0, 0, 1, 1], [], []>} : vector<8x32xbf16>, vector<32x128xbf16>, vector<8x128xf32> -> vector<8x128xf32>
    %50 = arith.index_cast %48 : i32 to index
    %c0_23 = arith.constant 0 : index
    %51 = vector.load %arg9[%50, %c0_23] : memref<64x128xf32, #tpu.memory_space<vmem>>, vector<8x128xf32>
    %52 = arith.addf %49, %51 : vector<8x128xf32>
    %53 = vector.extract_strided_slice %52 {offsets = [0, 0], sizes = [8, 32], strides = [1, 1]} : vector<8x128xf32> to vector<8x32xf32>
    %54 = arith.negf %53 : vector<8x32xf32>
    %55 = math.exp %54 : vector<8x32xf32>
    %cst_24 = arith.constant 1.000000e+00 : f32
    %56 = vector.broadcast %cst_24 : f32 to vector<8x32xf32>
    %57 = arith.addf %56, %55 : vector<8x32xf32>
    %58 = arith.divf %56, %57 : vector<8x32xf32>
    %59 = vector.extract_strided_slice %52 {offsets = [0, 32], sizes = [8, 32], strides = [1, 1]} : vector<8x128xf32> to vector<8x32xf32>
    %60 = arith.negf %59 : vector<8x32xf32>
    %61 = math.exp %60 : vector<8x32xf32>
    %cst_25 = arith.constant 1.000000e+00 : f32
    %62 = vector.broadcast %cst_25 : f32 to vector<8x32xf32>
    %63 = arith.addf %62, %61 : vector<8x32xf32>
    %64 = arith.divf %62, %63 : vector<8x32xf32>
    %65 = vector.extract_strided_slice %52 {offsets = [0, 64], sizes = [8, 32], strides = [1, 1]} : vector<8x128xf32> to vector<8x32xf32>
    %66 = math.tanh %65 : vector<8x32xf32>
    %67 = vector.extract_strided_slice %52 {offsets = [0, 96], sizes = [8, 32], strides = [1, 1]} : vector<8x128xf32> to vector<8x32xf32>
    %68 = arith.negf %67 : vector<8x32xf32>
    %69 = math.exp %68 : vector<8x32xf32>
    %cst_26 = arith.constant 1.000000e+00 : f32
    %70 = vector.broadcast %cst_26 : f32 to vector<8x32xf32>
    %71 = arith.addf %70, %69 : vector<8x32xf32>
    %72 = arith.divf %70, %71 : vector<8x32xf32>
    %73 = arith.mulf %64, %43 : vector<8x32xf32>
    %74 = arith.mulf %58, %66 : vector<8x32xf32>
    %75 = arith.addf %73, %74 : vector<8x32xf32>
    %76 = math.tanh %75 : vector<8x32xf32>
    %77 = arith.mulf %72, %76 : vector<8x32xf32>
    %c2_i32 = arith.constant 2 : i32
    %78 = arith.truncf %77 : vector<8x32xf32> to vector<8x32xbf16>
    %c8_i32_27 = arith.constant 8 : i32
    %79 = arith.muli %c2_i32, %c8_i32_27 : i32
    %80 = tpu.assume_multiple %79, 8 : i32
    %cst_28 = arith.constant dense<0.000000e+00> : vector<8x128xf32>
    %81 = tpu.matmul %78, %11, %cst_28 {dimension_numbers = #tpu.dot_dimension_numbers<[1], [0], [0], [1], [0, 0, 1, 1], [], []>} : vector<8x32xbf16>, vector<32x128xbf16>, vector<8x128xf32> -> vector<8x128xf32>
    %82 = arith.index_cast %80 : i32 to index
    %c0_29 = arith.constant 0 : index
    %83 = vector.load %arg9[%82, %c0_29] : memref<64x128xf32, #tpu.memory_space<vmem>>, vector<8x128xf32>
    %84 = arith.addf %81, %83 : vector<8x128xf32>
    %85 = vector.extract_strided_slice %84 {offsets = [0, 0], sizes = [8, 32], strides = [1, 1]} : vector<8x128xf32> to vector<8x32xf32>
    %86 = arith.negf %85 : vector<8x32xf32>
    %87 = math.exp %86 : vector<8x32xf32>
    %cst_30 = arith.constant 1.000000e+00 : f32
    %88 = vector.broadcast %cst_30 : f32 to vector<8x32xf32>
    %89 = arith.addf %88, %87 : vector<8x32xf32>
    %90 = arith.divf %88, %89 : vector<8x32xf32>
    %91 = vector.extract_strided_slice %84 {offsets = [0, 32], sizes = [8, 32], strides = [1, 1]} : vector<8x128xf32> to vector<8x32xf32>
    %92 = arith.negf %91 : vector<8x32xf32>
    %93 = math.exp %92 : vector<8x32xf32>
    %cst_31 = arith.constant 1.000000e+00 : f32
    %94 = vector.broadcast %cst_31 : f32 to vector<8x32xf32>
    %95 = arith.addf %94, %93 : vector<8x32xf32>
    %96 = arith.divf %94, %95 : vector<8x32xf32>
    %97 = vector.extract_strided_slice %84 {offsets = [0, 64], sizes = [8, 32], strides = [1, 1]} : vector<8x128xf32> to vector<8x32xf32>
    %98 = math.tanh %97 : vector<8x32xf32>
    %99 = vector.extract_strided_slice %84 {offsets = [0, 96], sizes = [8, 32], strides = [1, 1]} : vector<8x128xf32> to vector<8x32xf32>
    %100 = arith.negf %99 : vector<8x32xf32>
    %101 = math.exp %100 : vector<8x32xf32>
    %cst_32 = arith.constant 1.000000e+00 : f32
    %102 = vector.broadcast %cst_32 : f32 to vector<8x32xf32>
    %103 = arith.addf %102, %101 : vector<8x32xf32>
    %104 = arith.divf %102, %103 : vector<8x32xf32>
    %105 = arith.mulf %96, %75 : vector<8x32xf32>
    %106 = arith.mulf %90, %98 : vector<8x32xf32>
    %107 = arith.addf %105, %106 : vector<8x32xf32>
    %108 = math.tanh %107 : vector<8x32xf32>
    %109 = arith.mulf %104, %108 : vector<8x32xf32>
    %c3_i32 = arith.constant 3 : i32
    %110 = arith.truncf %109 : vector<8x32xf32> to vector<8x32xbf16>
    %c8_i32_33 = arith.constant 8 : i32
    %111 = arith.muli %c3_i32, %c8_i32_33 : i32
    %112 = tpu.assume_multiple %111, 8 : i32
    %cst_34 = arith.constant dense<0.000000e+00> : vector<8x128xf32>
    %113 = tpu.matmul %110, %11, %cst_34 {dimension_numbers = #tpu.dot_dimension_numbers<[1], [0], [0], [1], [0, 0, 1, 1], [], []>} : vector<8x32xbf16>, vector<32x128xbf16>, vector<8x128xf32> -> vector<8x128xf32>
    %114 = arith.index_cast %112 : i32 to index
    %c0_35 = arith.constant 0 : index
    %115 = vector.load %arg9[%114, %c0_35] : memref<64x128xf32, #tpu.memory_space<vmem>>, vector<8x128xf32>
    %116 = arith.addf %113, %115 : vector<8x128xf32>
    %117 = vector.extract_strided_slice %116 {offsets = [0, 0], sizes = [8, 32], strides = [1, 1]} : vector<8x128xf32> to vector<8x32xf32>
    %118 = arith.negf %117 : vector<8x32xf32>
    %119 = math.exp %118 : vector<8x32xf32>
    %cst_36 = arith.constant 1.000000e+00 : f32
    %120 = vector.broadcast %cst_36 : f32 to vector<8x32xf32>
    %121 = arith.addf %120, %119 : vector<8x32xf32>
    %122 = arith.divf %120, %121 : vector<8x32xf32>
    %123 = vector.extract_strided_slice %116 {offsets = [0, 32], sizes = [8, 32], strides = [1, 1]} : vector<8x128xf32> to vector<8x32xf32>
    %124 = arith.negf %123 : vector<8x32xf32>
    %125 = math.exp %124 : vector<8x32xf32>
    %cst_37 = arith.constant 1.000000e+00 : f32
    %126 = vector.broadcast %cst_37 : f32 to vector<8x32xf32>
    %127 = arith.addf %126, %125 : vector<8x32xf32>
    %128 = arith.divf %126, %127 : vector<8x32xf32>
    %129 = vector.extract_strided_slice %116 {offsets = [0, 64], sizes = [8, 32], strides = [1, 1]} : vector<8x128xf32> to vector<8x32xf32>
    %130 = math.tanh %129 : vector<8x32xf32>
    %131 = vector.extract_strided_slice %116 {offsets = [0, 96], sizes = [8, 32], strides = [1, 1]} : vector<8x128xf32> to vector<8x32xf32>
    %132 = arith.negf %131 : vector<8x32xf32>
    %133 = math.exp %132 : vector<8x32xf32>
    %cst_38 = arith.constant 1.000000e+00 : f32
    %134 = vector.broadcast %cst_38 : f32 to vector<8x32xf32>
    %135 = arith.addf %134, %133 : vector<8x32xf32>
    %136 = arith.divf %134, %135 : vector<8x32xf32>
    %137 = arith.mulf %128, %107 : vector<8x32xf32>
    %138 = arith.mulf %122, %130 : vector<8x32xf32>
    %139 = arith.addf %137, %138 : vector<8x32xf32>
    %140 = math.tanh %139 : vector<8x32xf32>
    %141 = arith.mulf %136, %140 : vector<8x32xf32>
    %c4_i32 = arith.constant 4 : i32
    %142 = arith.truncf %141 : vector<8x32xf32> to vector<8x32xbf16>
    %c8_i32_39 = arith.constant 8 : i32
    %143 = arith.muli %c4_i32, %c8_i32_39 : i32
    %144 = tpu.assume_multiple %143, 8 : i32
    %cst_40 = arith.constant dense<0.000000e+00> : vector<8x128xf32>
    %145 = tpu.matmul %142, %11, %cst_40 {dimension_numbers = #tpu.dot_dimension_numbers<[1], [0], [0], [1], [0, 0, 1, 1], [], []>} : vector<8x32xbf16>, vector<32x128xbf16>, vector<8x128xf32> -> vector<8x128xf32>
    %146 = arith.index_cast %144 : i32 to index
    %c0_41 = arith.constant 0 : index
    %147 = vector.load %arg9[%146, %c0_41] : memref<64x128xf32, #tpu.memory_space<vmem>>, vector<8x128xf32>
    %148 = arith.addf %145, %147 : vector<8x128xf32>
    %149 = vector.extract_strided_slice %148 {offsets = [0, 0], sizes = [8, 32], strides = [1, 1]} : vector<8x128xf32> to vector<8x32xf32>
    %150 = arith.negf %149 : vector<8x32xf32>
    %151 = math.exp %150 : vector<8x32xf32>
    %cst_42 = arith.constant 1.000000e+00 : f32
    %152 = vector.broadcast %cst_42 : f32 to vector<8x32xf32>
    %153 = arith.addf %152, %151 : vector<8x32xf32>
    %154 = arith.divf %152, %153 : vector<8x32xf32>
    %155 = vector.extract_strided_slice %148 {offsets = [0, 32], sizes = [8, 32], strides = [1, 1]} : vector<8x128xf32> to vector<8x32xf32>
    %156 = arith.negf %155 : vector<8x32xf32>
    %157 = math.exp %156 : vector<8x32xf32>
    %cst_43 = arith.constant 1.000000e+00 : f32
    %158 = vector.broadcast %cst_43 : f32 to vector<8x32xf32>
    %159 = arith.addf %158, %157 : vector<8x32xf32>
    %160 = arith.divf %158, %159 : vector<8x32xf32>
    %161 = vector.extract_strided_slice %148 {offsets = [0, 64], sizes = [8, 32], strides = [1, 1]} : vector<8x128xf32> to vector<8x32xf32>
    %162 = math.tanh %161 : vector<8x32xf32>
    %163 = vector.extract_strided_slice %148 {offsets = [0, 96], sizes = [8, 32], strides = [1, 1]} : vector<8x128xf32> to vector<8x32xf32>
    %164 = arith.negf %163 : vector<8x32xf32>
    %165 = math.exp %164 : vector<8x32xf32>
    %cst_44 = arith.constant 1.000000e+00 : f32
    %166 = vector.broadcast %cst_44 : f32 to vector<8x32xf32>
    %167 = arith.addf %166, %165 : vector<8x32xf32>
    %168 = arith.divf %166, %167 : vector<8x32xf32>
    %169 = arith.mulf %160, %139 : vector<8x32xf32>
    %170 = arith.mulf %154, %162 : vector<8x32xf32>
    %171 = arith.addf %169, %170 : vector<8x32xf32>
    %172 = math.tanh %171 : vector<8x32xf32>
    %173 = arith.mulf %168, %172 : vector<8x32xf32>
    %c5_i32 = arith.constant 5 : i32
    %174 = arith.truncf %173 : vector<8x32xf32> to vector<8x32xbf16>
    %c8_i32_45 = arith.constant 8 : i32
    %175 = arith.muli %c5_i32, %c8_i32_45 : i32
    %176 = tpu.assume_multiple %175, 8 : i32
    %cst_46 = arith.constant dense<0.000000e+00> : vector<8x128xf32>
    %177 = tpu.matmul %174, %11, %cst_46 {dimension_numbers = #tpu.dot_dimension_numbers<[1], [0], [0], [1], [0, 0, 1, 1], [], []>} : vector<8x32xbf16>, vector<32x128xbf16>, vector<8x128xf32> -> vector<8x128xf32>
    %178 = arith.index_cast %176 : i32 to index
    %c0_47 = arith.constant 0 : index
    %179 = vector.load %arg9[%178, %c0_47] : memref<64x128xf32, #tpu.memory_space<vmem>>, vector<8x128xf32>
    %180 = arith.addf %177, %179 : vector<8x128xf32>
    %181 = vector.extract_strided_slice %180 {offsets = [0, 0], sizes = [8, 32], strides = [1, 1]} : vector<8x128xf32> to vector<8x32xf32>
    %182 = arith.negf %181 : vector<8x32xf32>
    %183 = math.exp %182 : vector<8x32xf32>
    %cst_48 = arith.constant 1.000000e+00 : f32
    %184 = vector.broadcast %cst_48 : f32 to vector<8x32xf32>
    %185 = arith.addf %184, %183 : vector<8x32xf32>
    %186 = arith.divf %184, %185 : vector<8x32xf32>
    %187 = vector.extract_strided_slice %180 {offsets = [0, 32], sizes = [8, 32], strides = [1, 1]} : vector<8x128xf32> to vector<8x32xf32>
    %188 = arith.negf %187 : vector<8x32xf32>
    %189 = math.exp %188 : vector<8x32xf32>
    %cst_49 = arith.constant 1.000000e+00 : f32
    %190 = vector.broadcast %cst_49 : f32 to vector<8x32xf32>
    %191 = arith.addf %190, %189 : vector<8x32xf32>
    %192 = arith.divf %190, %191 : vector<8x32xf32>
    %193 = vector.extract_strided_slice %180 {offsets = [0, 64], sizes = [8, 32], strides = [1, 1]} : vector<8x128xf32> to vector<8x32xf32>
    %194 = math.tanh %193 : vector<8x32xf32>
    %195 = vector.extract_strided_slice %180 {offsets = [0, 96], sizes = [8, 32], strides = [1, 1]} : vector<8x128xf32> to vector<8x32xf32>
    %196 = arith.negf %195 : vector<8x32xf32>
    %197 = math.exp %196 : vector<8x32xf32>
    %cst_50 = arith.constant 1.000000e+00 : f32
    %198 = vector.broadcast %cst_50 : f32 to vector<8x32xf32>
    %199 = arith.addf %198, %197 : vector<8x32xf32>
    %200 = arith.divf %198, %199 : vector<8x32xf32>
    %201 = arith.mulf %192, %171 : vector<8x32xf32>
    %202 = arith.mulf %186, %194 : vector<8x32xf32>
    %203 = arith.addf %201, %202 : vector<8x32xf32>
    %204 = math.tanh %203 : vector<8x32xf32>
    %205 = arith.mulf %200, %204 : vector<8x32xf32>
    %c6_i32 = arith.constant 6 : i32
    %206 = arith.truncf %205 : vector<8x32xf32> to vector<8x32xbf16>
    %c8_i32_51 = arith.constant 8 : i32
    %207 = arith.muli %c6_i32, %c8_i32_51 : i32
    %208 = tpu.assume_multiple %207, 8 : i32
    %cst_52 = arith.constant dense<0.000000e+00> : vector<8x128xf32>
    %209 = tpu.matmul %206, %11, %cst_52 {dimension_numbers = #tpu.dot_dimension_numbers<[1], [0], [0], [1], [0, 0, 1, 1], [], []>} : vector<8x32xbf16>, vector<32x128xbf16>, vector<8x128xf32> -> vector<8x128xf32>
    %210 = arith.index_cast %208 : i32 to index
    %c0_53 = arith.constant 0 : index
    %211 = vector.load %arg9[%210, %c0_53] : memref<64x128xf32, #tpu.memory_space<vmem>>, vector<8x128xf32>
    %212 = arith.addf %209, %211 : vector<8x128xf32>
    %213 = vector.extract_strided_slice %212 {offsets = [0, 0], sizes = [8, 32], strides = [1, 1]} : vector<8x128xf32> to vector<8x32xf32>
    %214 = arith.negf %213 : vector<8x32xf32>
    %215 = math.exp %214 : vector<8x32xf32>
    %cst_54 = arith.constant 1.000000e+00 : f32
    %216 = vector.broadcast %cst_54 : f32 to vector<8x32xf32>
    %217 = arith.addf %216, %215 : vector<8x32xf32>
    %218 = arith.divf %216, %217 : vector<8x32xf32>
    %219 = vector.extract_strided_slice %212 {offsets = [0, 32], sizes = [8, 32], strides = [1, 1]} : vector<8x128xf32> to vector<8x32xf32>
    %220 = arith.negf %219 : vector<8x32xf32>
    %221 = math.exp %220 : vector<8x32xf32>
    %cst_55 = arith.constant 1.000000e+00 : f32
    %222 = vector.broadcast %cst_55 : f32 to vector<8x32xf32>
    %223 = arith.addf %222, %221 : vector<8x32xf32>
    %224 = arith.divf %222, %223 : vector<8x32xf32>
    %225 = vector.extract_strided_slice %212 {offsets = [0, 64], sizes = [8, 32], strides = [1, 1]} : vector<8x128xf32> to vector<8x32xf32>
    %226 = math.tanh %225 : vector<8x32xf32>
    %227 = vector.extract_strided_slice %212 {offsets = [0, 96], sizes = [8, 32], strides = [1, 1]} : vector<8x128xf32> to vector<8x32xf32>
    %228 = arith.negf %227 : vector<8x32xf32>
    %229 = math.exp %228 : vector<8x32xf32>
    %cst_56 = arith.constant 1.000000e+00 : f32
    %230 = vector.broadcast %cst_56 : f32 to vector<8x32xf32>
    %231 = arith.addf %230, %229 : vector<8x32xf32>
    %232 = arith.divf %230, %231 : vector<8x32xf32>
    %233 = arith.mulf %224, %203 : vector<8x32xf32>
    %234 = arith.mulf %218, %226 : vector<8x32xf32>
    %235 = arith.addf %233, %234 : vector<8x32xf32>
    %236 = math.tanh %235 : vector<8x32xf32>
    %237 = arith.mulf %232, %236 : vector<8x32xf32>
    %c7_i32 = arith.constant 7 : i32
    %238 = arith.truncf %237 : vector<8x32xf32> to vector<8x32xbf16>
    %c8_i32_57 = arith.constant 8 : i32
    %239 = arith.muli %c7_i32, %c8_i32_57 : i32
    %240 = tpu.assume_multiple %239, 8 : i32
    %cst_58 = arith.constant dense<0.000000e+00> : vector<8x128xf32>
    %241 = tpu.matmul %238, %11, %cst_58 {dimension_numbers = #tpu.dot_dimension_numbers<[1], [0], [0], [1], [0, 0, 1, 1], [], []>} : vector<8x32xbf16>, vector<32x128xbf16>, vector<8x128xf32> -> vector<8x128xf32>
    %242 = arith.index_cast %240 : i32 to index
    %c0_59 = arith.constant 0 : index
    %243 = vector.load %arg9[%242, %c0_59] : memref<64x128xf32, #tpu.memory_space<vmem>>, vector<8x128xf32>
    %244 = arith.addf %241, %243 : vector<8x128xf32>
    %245 = vector.extract_strided_slice %244 {offsets = [0, 0], sizes = [8, 32], strides = [1, 1]} : vector<8x128xf32> to vector<8x32xf32>
    %246 = arith.negf %245 : vector<8x32xf32>
    %247 = math.exp %246 : vector<8x32xf32>
    %cst_60 = arith.constant 1.000000e+00 : f32
    %248 = vector.broadcast %cst_60 : f32 to vector<8x32xf32>
    %249 = arith.addf %248, %247 : vector<8x32xf32>
    %250 = arith.divf %248, %249 : vector<8x32xf32>
    %251 = vector.extract_strided_slice %244 {offsets = [0, 32], sizes = [8, 32], strides = [1, 1]} : vector<8x128xf32> to vector<8x32xf32>
    %252 = arith.negf %251 : vector<8x32xf32>
    %253 = math.exp %252 : vector<8x32xf32>
    %cst_61 = arith.constant 1.000000e+00 : f32
    %254 = vector.broadcast %cst_61 : f32 to vector<8x32xf32>
    %255 = arith.addf %254, %253 : vector<8x32xf32>
    %256 = arith.divf %254, %255 : vector<8x32xf32>
    %257 = vector.extract_strided_slice %244 {offsets = [0, 64], sizes = [8, 32], strides = [1, 1]} : vector<8x128xf32> to vector<8x32xf32>
    %258 = math.tanh %257 : vector<8x32xf32>
    %259 = vector.extract_strided_slice %244 {offsets = [0, 96], sizes = [8, 32], strides = [1, 1]} : vector<8x128xf32> to vector<8x32xf32>
    %260 = arith.negf %259 : vector<8x32xf32>
    %261 = math.exp %260 : vector<8x32xf32>
    %cst_62 = arith.constant 1.000000e+00 : f32
    %262 = vector.broadcast %cst_62 : f32 to vector<8x32xf32>
    %263 = arith.addf %262, %261 : vector<8x32xf32>
    %264 = arith.divf %262, %263 : vector<8x32xf32>
    %265 = arith.mulf %256, %235 : vector<8x32xf32>
    %266 = arith.mulf %250, %258 : vector<8x32xf32>
    %267 = arith.addf %265, %266 : vector<8x32xf32>
    %268 = math.tanh %267 : vector<8x32xf32>
    %269 = arith.mulf %264, %268 : vector<8x32xf32>
    %c8_i32_63 = arith.constant 8 : i32
    %c0_64 = arith.constant 0 : index
    %c0_65 = arith.constant 0 : index
    %270 = vector.load %arg10[%c0_64, %c0_65] : memref<8x32xf32, #tpu.memory_space<vmem>>, vector<8x32xf32>
    tpu.vector_store %arg10[%c0_64, %c0_65], %269 {strides = array<i32>} : memref<8x32xf32, #tpu.memory_space<vmem>>, vector<8x32xf32>,
    %c0_66 = arith.constant 0 : index
    %c0_67 = arith.constant 0 : index
    %271 = vector.load %arg11[%c0_66, %c0_67] : memref<8x32xf32, #tpu.memory_space<vmem>>, vector<8x32xf32>
    tpu.vector_store %arg11[%c0_66, %c0_67], %267 {strides = array<i32>} : memref<8x32xf32, #tpu.memory_space<vmem>>, vector<8x32xf32>,
    %c0_i32_68 = arith.constant 0 : i32
    %272 = arith.cmpi eq, %arg1, %c0_i32_68 : i32
    %273 = arith.extui %272 : i1 to i32
    %c0_i32_69 = arith.constant 0 : i32
    %274 = arith.cmpi ne, %273, %c0_i32_69 : i32
    scf.if %274 {
      %275 = arith.truncf %269 : vector<8x32xf32> to vector<8x32xbf16>
      %c0_70 = arith.constant 0 : index
      %c0_71 = arith.constant 0 : index
      %276 = vector.load %arg6[%c0_70, %c0_71] : memref<32x4xbf16, #tpu.memory_space<vmem>>, vector<32x4xbf16>
      %cst_72 = arith.constant dense<0.000000e+00> : vector<8x4xf32>
      %277 = tpu.matmul %275, %276, %cst_72 {dimension_numbers = #tpu.dot_dimension_numbers<[1], [0], [0], [1], [0, 0, 1, 1], [], []>} : vector<8x32xbf16>, vector<32x4xbf16>, vector<8x4xf32> -> vector<8x4xf32>
      %c0_73 = arith.constant 0 : index
      %c0_74 = arith.constant 0 : index
      %278 = vector.load %arg7[%c0_73, %c0_74] : memref<1x4xf32, #tpu.memory_space<vmem>>, vector<1x4xf32>
      %279 = vector.broadcast %278 : vector<1x4xf32> to vector<8x4xf32>
      %280 = arith.addf %277, %279 : vector<8x4xf32>
      %c0_75 = arith.constant 0 : index
      %c0_76 = arith.constant 0 : index
      %281 = vector.load %arg8[%c0_75, %c0_76] : memref<8x4xf32, #tpu.memory_space<vmem>>, vector<8x4xf32>
      tpu.vector_store %arg8[%c0_75, %c0_76], %280 {strides = array<i32>} : memref<8x4xf32, #tpu.memory_space<vmem>>, vector<8x4xf32>,
    } else {
    }
    return
  }
  func.func @transform_0(%arg0: i32, %arg1: i32) -> (i32, i32, i32) {
    %c0_i32 = arith.constant 0 : i32
    %c0_i32_0 = arith.constant 0 : i32
    return %arg1, %arg0, %c0_i32 : i32, i32, i32
  }
  func.func @transform_1(%arg0: i32, %arg1: i32) -> (i32, i32) {
    %c0_i32 = arith.constant 0 : i32
    %c0_i32_0 = arith.constant 0 : i32
    %c0_i32_1 = arith.constant 0 : i32
    return %c0_i32, %c0_i32_0 : i32, i32
  }
  func.func @transform_2(%arg0: i32, %arg1: i32) -> (i32, i32) {
    %c0_i32 = arith.constant 0 : i32
    %c0_i32_0 = arith.constant 0 : i32
    %c0_i32_1 = arith.constant 0 : i32
    return %c0_i32, %c0_i32_0 : i32, i32
  }
  func.func @transform_3(%arg0: i32, %arg1: i32) -> (i32, i32) {
    %c0_i32 = arith.constant 0 : i32
    %c0_i32_0 = arith.constant 0 : i32
    %c0_i32_1 = arith.constant 0 : i32
    return %c0_i32, %c0_i32_0 : i32, i32
  }
  func.func @transform_4(%arg0: i32, %arg1: i32) -> (i32, i32) {
    %c0_i32 = arith.constant 0 : i32
    %c0_i32_0 = arith.constant 0 : i32
    %c0_i32_1 = arith.constant 0 : i32
    return %c0_i32, %c0_i32_0 : i32, i32
  }
  func.func @transform_5(%arg0: i32, %arg1: i32) -> (i32, i32) {
    %c0_i32 = arith.constant 0 : i32
    %c0_i32_0 = arith.constant 0 : i32
    %c0_i32_1 = arith.constant 0 : i32
    return %c0_i32, %c0_i32_0 : i32, i32
  }
  func.func @transform_6(%arg0: i32, %arg1: i32) -> (i32, i32) {
    %c0_i32 = arith.constant 0 : i32
    %c0_i32_0 = arith.constant 0 : i32
    return %arg0, %c0_i32 : i32, i32
  }
}

</mosaic_0001>

<bundles_post_ra>
// kernel: lstm_model_forward.3
= control target key start
LH: loop header
LB: loop body
LE: loop exit
PB: predicated region body
PF: predicated region fallthrough
CT: control target
= control target key end

     0   :  { %vm28_vm0 = vcmask 261120   ;;  %v1088_v1 = vmov 0.0   ;;  %vm1089_vm1 = vmmov 0   ;;  %s1090_s9 = smov 64   ;;  %s1092_s17 = smov 96   ;;  %vm853_vm2 = vcmask 31744   ;;  %s1304_s1 = inlined_call_operand.vmem [shape: bf16[32,128], index: 1, kind: input, shape index: {}]   ;;  %s1305_s2 = inlined_call_operand.vmem [shape: bf16[32,128], index: 2, kind: input, shape index: {}]   ;;  %s1306_s0 = inlined_call_operand.vmem [shape: bf16[8,8,32], index: 0, kind: input, shape index: {}]   ;;  %s1307_s3 = inlined_call_operand.vmem [shape: f32[1,128], index: 3, kind: input, shape index: {}]   ;;  %s1308_s4 = inlined_call_operand.vmem [shape: bf16[32,4], index: 4, kind: input, shape index: {}]   ;;  %s1309_s5 = inlined_call_operand.vmem [shape: f32[1,4], index: 5, kind: input, shape index: {}]   ;;  %s1310_s6 = inlined_call_operand.vmem [shape: f32[8,4], index: 6, kind: output, shape index: {}]  }
   0x1   :  { %v1014_v0 = vld [vmem:[%s1304_s1] sm:$0xff]   ;;  %937 = vmatprep.subr.bf16.mxu1 %v1088_v1  ;;  %29 = vst.msk [vmem:[#allocation3] sm:$0xff] %vm28_vm0, %v1088_v1  ;;  %30 = vst.msk [vmem:[#allocation4] sm:$0xff] %vm28_vm0, %v1088_v1  ;;  %941 = vmatprep.mubr.msk.bf16.mxu1 %vm1089_vm1, %v1088_v1  ;;  %v1016_v3 = vld [vmem:[%s1304_s1 + $0x8] sm:$0xff]  }
   0x2   :  { %v1141_v2 = vld [vmem:[%s1305_s2] sm:$0xff]   ;;  %925 = vmatprep.subr.bf16.mxu0 %v1014_v0  ;;  %v1150_v4 = vld [vmem:[%s1305_s2 + $0x8] sm:$0xff]   ;;  %v1020_v53 = vld [vmem:[%s1306_s0 + $0x10] sm:$0xff]  }
   0x3   :  { %926 = vmatpush3.bf16.msra.mxu0 %v1014_v0  ;;  %938 = vmatpush3.bf16.msra.mxu1 %v1141_v2  ;;  %v1018_v5 = vld [vmem:[%s1306_s0] sm:$0xff]   ;;  %v1019_v6 = vld [vmem:[%s1306_s0 + $0x8] sm:$0xff]   ;;  %v1021_v54 = vld [vmem:[%s1306_s0 + $0x18] sm:$0xff]  }
   0x4   :  { %927 = vmatprep.subr.bf16.mxu0 %v1016_v3  ;;  %939 = vmatprep.subr.bf16.mxu1 %v1088_v1  ;;  %v1178_v9 = vld [vmem:[%s1307_s3] ss:$0 sm:$0xff]  ;;  %s1091_s3 = smov 32  }
   0x5   :  { %929 = vmatprep.mubr.msk.bf16.mxu0 %vm28_vm0, %v1018_v5 }
   0x7   :  { %928 = vmatpush3.bf16.msra.mxu0 %v1016_v3  ;;  %940 = vmatpush3.bf16.msra.mxu1 %v1150_v4 }
   0x8   :  { %v172_v7 = vld [vmem:[#allocation3] sm:$0xff]  ;;  %945 = vmatprep.subr.bf16.mxu1 %v1088_v1  ;;  %953 = vmatprep.subr.bf16.mxu0 %v1088_v1  ;;  %v173_v21 = vld [vmem:[#allocation4] sm:$0xff] }
   0x9   :  { %v174_v8 = vpack.c.bf16 %v172_v7, %v172_v7 }
   0xa   :  { %930 = vmatmul.mubr.msk.bf16.vlgmr.msra.gmra.mrb[0].mxu0 %vm28_vm0, %v1019_v6 }
   0xb   :  { %942 = vmatmul.mubr.msk.bf16.vlgmr.msra.gmra.mrb[0].mxu1 %vm28_vm0, %v174_v8  ;;  %954 = vmatpush3.bf16.msra.mxu0 %v1141_v2 }
   0xc   :  { %946 = vmatpush3.bf16.msra.mxu1 %v1141_v2  ;;  %949 = vmatprep.mubr.msk.bf16.mxu1 %vm1089_vm1, %v1088_v1 }
   0xd   :  { %947 = vmatprep.subr.bf16.mxu1 %v1088_v1  ;;  %955 = vmatprep.subr.bf16.mxu0 %v1088_v1 }
   0xe   :  { %933 = vmatprep.mubr.msk.bf16.mxu0 %vm28_vm0, %v1020_v53 }
   0xf   :  { %956 = vmatpush3.bf16.msra.mxu0 %v1150_v4 }
  0x10   :  { %948 = vmatpush3.bf16.msra.mxu1 %v1150_v4  ;;  %969 = vmatprep.subr.bf16.mxu0 %v1088_v1 }
  0x11   :  { %961 = vmatprep.subr.bf16.mxu1 %v1088_v1 }
  0x12   :  { %934 = vmatmul.mubr.msk.bf16.gmra.mrb[4].mxu0 %vm28_vm0, %v1021_v54 }
  0x13   :  { %957 = vmatprep.mubr.msk.bf16.mxu0 %vm1089_vm1, %v1088_v1 }
  0xdd   :  { %v1180_v10 = vpop.f32.mrb[0].mxu0 }
  0xde   :  { %v225_v11 = vpop.f32.mrb[0].mxu1  ;;  %v129_v12 = vpop.f32.mrb[1].mxu0  ;;  %v138_v0 = vadd.f32 %v1180_v10, %v1178_v9 }
  0xdf   :  { %v943_v13 = vpop.f32.mrb[1].mxu1  ;;  %v130_v14 = vadd.f32 %v1178_v9, %v129_v12  ;;  %v1183_v15 = vpop.f32.mrb[2].mxu0 }
  0xe0   :  { %v228_v16 = vpop.f32.mrb[2].mxu1  ;;  %v132_v17 = vpop.f32.mrb[3].mxu0 }
  0xe1   :  { %v944_v18 = vpop.f32.mrb[3].mxu1  ;;  %v226_v19 = vadd.f32 %v225_v11, %v130_v14  ;;  %v133_v37 = vadd.f32 %v1178_v9, %v132_v17 }
  0xe3   :  { %1024 = vtanh.f32 %v226_v19  ;;  %v873_v22 = vmul.f32 -1.442695, %v226_v19 }
  0xe5   :  { %1026 = vpow2.f32 %v873_v22  ;;  %v1212_v59 = vpop.f32.mrb[4].mxu0 }
  0xe6   :  { %v1214_v60 = vpop.f32.mrb[5].mxu0 }
  0xe7   :  { %v1216_v61 = vpop.f32.mrb[6].mxu0 }
  0xe8   :  { %v1218_v62 = vpop.f32.mrb[7].mxu0 }
  0xed   :  { %v1025_v20 = vpop.eup %1024 }
  0xee   :  { %244 = vrot.lane.b32.xlu0 %v1025_v20, %s1090_s9 }
  0xef   :  { %v1027_v23 = vpop.eup %1026 }
  0xf0   :  { %v234_v24 = vadd.f32 1.0, %v1027_v23 }
  0xf2   :  { %239 = vrot.lane.b32.xlu0 %v173_v21, %s1091_s3  ;;  %1028 = vrcp.f32 %v234_v24 }
  0xfc   :  { %v1029_v25 = vpop.eup %1028 }
 0x160   :  { %v245_v26 = vpop.permute.xlu0 %244 }
 0x161   :  { %v247_v27 = vmul.f32 %v1029_v25, %v245_v26  ;;  %v141_v26 = vadd.f32 %v1183_v15, %v1178_v9 }
 0x163   :  { %249 = vrot.lane.b32.xlu1 %v247_v27, %s1091_s3 }
 0x164   :  { %v240_v28 = vpop.permute.xlu0 %239 }
 0x165   :  { %v242_v29 = vmul.f32 %v1029_v25, %v240_v28 }
 0x1d5   :  { %v250_v30 = vpop.permute.xlu1 %249 }
 0x1d6   :  { %v252_v31 = vadd.f32 %v250_v30, %v242_v29 }
 0x1d8   :  { %1030 = vtanh.f32 %v252_v31 }
 0x1e2   :  { %v1031_v32 = vpop.eup %1030 }
 0x1e3   :  { %255 = vrot.lane.b32.xlu1 %v1031_v32, %s1090_s9 }
 0x255   :  { %v256_v33 = vpop.permute.xlu1 %255 }
 0x256   :  { %v258_v34 = vmul.f32 %v1029_v25, %v256_v33 }
 0x258   :  { %v259_v35 = vpack.c.bf16 %v258_v34, %v258_v34 }
 0x25a   :  { %263 = vrot.lane.b32.xlu0 %v259_v35, %s1091_s3 }
 0x2cc   :  { %v264_v36 = vpop.permute.xlu0 %263 }
 0x2cd   :  { %950 = vmatmul.mubr.msk.bf16.vlgmr.msra.gmra.mrb[4].mxu1 %vm28_vm0, %v264_v36 }
 0x2ce   :  { %962 = vmatpush3.bf16.msra.mxu1 %v1141_v2  ;;  %965 = vmatprep.mubr.msk.bf16.mxu1 %vm1089_vm1, %v1088_v1 }
 0x2cf   :  { %963 = vmatprep.subr.bf16.mxu1 %v1088_v1 }
 0x2d2   :  { %964 = vmatpush3.bf16.msra.mxu1 %v1150_v4 }
 0x2d3   :  { %977 = vmatprep.subr.bf16.mxu1 %v1088_v1 }
 0x3a0   :  { %v302_v38 = vpop.f32.mrb[4].mxu1 }
 0x3a1   :  { %v303_v39 = vadd.f32 %v302_v38, %v133_v37  ;;  %v951_v40 = vpop.f32.mrb[5].mxu1 }
 0x3a2   :  { %v305_v41 = vpop.f32.mrb[6].mxu1 }
 0x3a3   :  { %1032 = vtanh.f32 %v303_v39  ;;  %v952_v42 = vpop.f32.mrb[7].mxu1  ;;  %v875_v44 = vmul.f32 -1.442695, %v303_v39 }
 0x3a5   :  { %1034 = vpow2.f32 %v875_v44 }
 0x3ad   :  { %v1033_v43 = vpop.eup %1032 }
 0x3ae   :  { %317 = vrot.lane.b32.xlu1 %v1033_v43, %s1090_s9 }
 0x3af   :  { %v1035_v45 = vpop.eup %1034 }
 0x3b0   :  { %v311_v46 = vadd.f32 1.0, %v1035_v45 }
 0x3b2   :  { %1036 = vrcp.f32 %v311_v46  ;;  %v146_v46 = vadd.f32 %v1178_v9, %v1214_v60 }
 0x3bc   :  { %v1037_v47 = vpop.eup %1036 }
 0x3bd   :  { %v315_v50 = vmul.f32 %v1037_v47, %v252_v31 }
 0x420   :  { %v318_v48 = vpop.permute.xlu1 %317 }
 0x421   :  { %v320_v49 = vmul.f32 %v1037_v47, %v318_v48 }
 0x423   :  { %322 = vrot.lane.b32.xlu0 %v320_v49, %s1091_s3 }
 0x495   :  { %v323_v51 = vpop.permute.xlu0 %322 }
 0x496   :  { %v325_v52 = vadd.f32 %v323_v51, %v315_v50 }
 0x498   :  { %1038 = vtanh.f32 %v325_v52 }
 0x4a2   :  { %v1039_v55 = vpop.eup %1038 }
 0x4a3   :  { %328 = vrot.lane.b32.xlu1 %v1039_v55, %s1090_s9 }
 0x515   :  { %v329_v56 = vpop.permute.xlu1 %328 }
 0x516   :  { %v331_v57 = vmul.f32 %v1037_v47, %v329_v56 }
 0x518   :  { %v332_v58 = vpack.c.bf16 %v331_v57, %v331_v57 }
 0x51a   :  { %336 = vrot.lane.b32.xlu0 %v332_v58, %s1091_s3 }
 0x58c   :  { %v337_v63 = vpop.permute.xlu0 %336 }
 0x58d   :  { %958 = vmatmul.mubr.msk.bf16.vlgmr.msra.gmra.mrb[8].mxu0 %vm28_vm0, %v337_v63 }
 0x58e   :  { %970 = vmatpush3.bf16.msra.mxu0 %v1141_v2  ;;  %973 = vmatprep.mubr.msk.bf16.mxu0 %vm1089_vm1, %v1088_v1 }
 0x58f   :  { %971 = vmatprep.subr.bf16.mxu0 %v1088_v1 }
 0x592   :  { %972 = vmatpush3.bf16.msra.mxu0 %v1150_v4 }
 0x593   :  { %985 = vmatprep.subr.bf16.mxu0 %v1088_v1 }
 0x660   :  { %v375_v3 = vpop.f32.mrb[8].mxu0 }
 0x661   :  { %v376_v5 = vadd.f32 %v375_v3, %v138_v0  ;;  %v959_v6 = vpop.f32.mrb[9].mxu0 }
 0x662   :  { %v378_v7 = vpop.f32.mrb[10].mxu0 }
 0x663   :  { %1040 = vtanh.f32 %v376_v5  ;;  %v960_v8 = vpop.f32.mrb[11].mxu0  ;;  %v877_v12 = vmul.f32 -1.442695, %v376_v5 }
 0x665   :  { %1042 = vpow2.f32 %v877_v12 }
 0x66d   :  { %v1041_v11 = vpop.eup %1040 }
 0x66e   :  { %390 = vrot.lane.b32.xlu1 %v1041_v11, %s1090_s9  ;;  %v149_v11 = vadd.f32 %v1178_v9, %v1218_v62 }
 0x66f   :  { %v1043_v13 = vpop.eup %1042 }
 0x670   :  { %v384_v14 = vadd.f32 1.0, %v1043_v13 }
 0x672   :  { %1044 = vrcp.f32 %v384_v14 }
 0x67c   :  { %v1045_v16 = vpop.eup %1044 }
 0x67d   :  { %v388_v10 = vmul.f32 %v1045_v16, %v325_v52 }
 0x6e0   :  { %v391_v17 = vpop.permute.xlu1 %390 }
 0x6e1   :  { %v393_v18 = vmul.f32 %v1045_v16, %v391_v17 }
 0x6e3   :  { %395 = vrot.lane.b32.xlu0 %v393_v18, %s1091_s3 }
 0x755   :  { %v396_v19 = vpop.permute.xlu0 %395 }
 0x756   :  { %v398_v20 = vadd.f32 %v396_v19, %v388_v10 }
 0x758   :  { %1046 = vtanh.f32 %v398_v20 }
 0x762   :  { %v1047_v21 = vpop.eup %1046 }
 0x763   :  { %401 = vrot.lane.b32.xlu1 %v1047_v21, %s1090_s9 }
 0x7d5   :  { %v402_v22 = vpop.permute.xlu1 %401 }
 0x7d6   :  { %v404_v23 = vmul.f32 %v1045_v16, %v402_v22 }
 0x7d8   :  { %v405_v24 = vpack.c.bf16 %v404_v23, %v404_v23 }
 0x7da   :  { %409 = vrot.lane.b32.xlu0 %v405_v24, %s1091_s3 }
 0x84c   :  { %v410_v25 = vpop.permute.xlu0 %409 }
 0x84d   :  { %966 = vmatmul.mubr.msk.bf16.vlgmr.msra.gmra.mrb[8].mxu1 %vm28_vm0, %v410_v25 }
 0x84e   :  { %978 = vmatpush3.bf16.msra.mxu1 %v1141_v2  ;;  %981 = vmatprep.mubr.msk.bf16.mxu1 %vm1089_vm1, %v1088_v1 }
 0x84f   :  { %979 = vmatprep.subr.bf16.mxu1 %v1088_v1 }
 0x852   :  { %980 = vmatpush3.bf16.msra.mxu1 %v1150_v4 }
 0x853   :  { %993 = vmatprep.subr.bf16.mxu1 %v1088_v1 }
 0x920   :  { %v448_v27 = vpop.f32.mrb[8].mxu1 }
 0x921   :  { %v449_v28 = vadd.f32 %v448_v27, %v141_v26  ;;  %v967_v29 = vpop.f32.mrb[9].mxu1 }
 0x922   :  { %v451_v30 = vpop.f32.mrb[10].mxu1  ;;  %v154_v29 = vadd.f32 %v1212_v59, %v1178_v9 }
 0x923   :  { %1048 = vtanh.f32 %v449_v28  ;;  %v968_v31 = vpop.f32.mrb[11].mxu1  ;;  %v879_v33 = vmul.f32 -1.442695, %v449_v28 }
 0x925   :  { %1050 = vpow2.f32 %v879_v33 }
 0x92d   :  { %v1049_v32 = vpop.eup %1048 }
 0x92e   :  { %463 = vrot.lane.b32.xlu1 %v1049_v32, %s1090_s9 }
 0x92f   :  { %v1051_v34 = vpop.eup %1050 }
 0x930   :  { %v457_v35 = vadd.f32 1.0, %v1051_v34 }
 0x932   :  { %1052 = vrcp.f32 %v457_v35 }
 0x93c   :  { %v1053_v36 = vpop.eup %1052 }
 0x93d   :  { %v461_v15 = vmul.f32 %v1053_v36, %v398_v20 }
 0x9a0   :  { %v464_v37 = vpop.permute.xlu1 %463 }
 0x9a1   :  { %v466_v38 = vmul.f32 %v1053_v36, %v464_v37 }
 0x9a3   :  { %468 = vrot.lane.b32.xlu0 %v466_v38, %s1091_s3 }
 0xa15   :  { %v469_v39 = vpop.permute.xlu0 %468 }
 0xa16   :  { %v471_v40 = vadd.f32 %v469_v39, %v461_v15 }
 0xa18   :  { %1054 = vtanh.f32 %v471_v40 }
 0xa22   :  { %v1055_v41 = vpop.eup %1054 }
 0xa23   :  { %474 = vrot.lane.b32.xlu1 %v1055_v41, %s1090_s9 }
 0xa95   :  { %v475_v42 = vpop.permute.xlu1 %474 }
 0xa96   :  { %v477_v43 = vmul.f32 %v1053_v36, %v475_v42 }
 0xa98   :  { %v478_v44 = vpack.c.bf16 %v477_v43, %v477_v43 }
 0xa9a   :  { %482 = vrot.lane.b32.xlu0 %v478_v44, %s1091_s3 }
 0xb0c   :  { %v483_v45 = vpop.permute.xlu0 %482 }
 0xb0d   :  { %974 = vmatmul.mubr.msk.bf16.vlgmr.msra.gmra.mrb[12].mxu0 %vm28_vm0, %v483_v45 }
 0xb0e   :  { %986 = vmatpush3.bf16.msra.mxu0 %v1141_v2  ;;  %989 = vmatprep.mubr.msk.bf16.mxu0 %vm1089_vm1, %v1088_v1 }
 0xb0f   :  { %987 = vmatprep.subr.bf16.mxu0 %v1088_v1 }
 0xb12   :  { %988 = vmatpush3.bf16.msra.mxu0 %v1150_v4 }
 0xb13   :  { %1001 = vmatprep.subr.bf16.mxu0 %v1088_v1 }
 0xbe0   :  { %v521_v47 = vpop.f32.mrb[12].mxu0 }
 0xbe1   :  { %v522_v48 = vadd.f32 %v521_v47, %v146_v46  ;;  %v975_v49 = vpop.f32.mrb[13].mxu0 }
 0xbe2   :  { %v524_v50 = vpop.f32.mrb[14].mxu0 }
 0xbe3   :  { %1056 = vtanh.f32 %v522_v48  ;;  %v976_v51 = vpop.f32.mrb[15].mxu0  ;;  %v881_v53 = vmul.f32 -1.442695, %v522_v48  ;;  %v157_v48 = vadd.f32 %v1216_v61, %v1178_v9 }
 0xbe5   :  { %1058 = vpow2.f32 %v881_v53 }
 0xbed   :  { %v1057_v52 = vpop.eup %1056 }
 0xbee   :  { %536 = vrot.lane.b32.xlu1 %v1057_v52, %s1090_s9 }
 0xbef   :  { %v1059_v54 = vpop.eup %1058 }
 0xbf0   :  { %v530_v55 = vadd.f32 1.0, %v1059_v54 }
 0xbf2   :  { %1060 = vrcp.f32 %v530_v55 }
 0xbfc   :  { %v1061_v56 = vpop.eup %1060 }
 0xbfd   :  { %v534_v60 = vmul.f32 %v1061_v56, %v471_v40 }
 0xc60   :  { %v537_v57 = vpop.permute.xlu1 %536 }
 0xc61   :  { %v539_v58 = vmul.f32 %v1061_v56, %v537_v57 }
 0xc63   :  { %541 = vrot.lane.b32.xlu0 %v539_v58, %s1091_s3 }
 0xcd5   :  { %v542_v63 = vpop.permute.xlu0 %541 }
 0xcd6   :  { %v544_v0 = vadd.f32 %v542_v63, %v534_v60 }
 0xcd8   :  { %1062 = vtanh.f32 %v544_v0 }
 0xce2   :  { %v1063_v3 = vpop.eup %1062 }
 0xce3   :  { %547 = vrot.lane.b32.xlu1 %v1063_v3, %s1090_s9  ;;  %v1022_v3 = vld [vmem:[%s1308_s4] sm:$0xff]  }
 0xd55   :  { %v548_v5 = vpop.permute.xlu1 %547 }
 0xd56   :  { %v550_v6 = vmul.f32 %v1061_v56, %v548_v5  ;;  %v1023_v5 = vld [vmem:[%s1308_s4 + $0x8] sm:$0xff]  }
 0xd58   :  { %v551_v7 = vpack.c.bf16 %v550_v6, %v550_v6 }
 0xd5a   :  { %555 = vrot.lane.b32.xlu0 %v551_v7, %s1091_s3 }
 0xdcc   :  { %v556_v8 = vpop.permute.xlu0 %555 }
 0xdcd   :  { %982 = vmatmul.mubr.msk.bf16.vlgmr.msra.gmra.mrb[12].mxu1 %vm28_vm0, %v556_v8 }
 0xdce   :  { %994 = vmatpush3.bf16.msra.mxu1 %v1141_v2  ;;  %997 = vmatprep.mubr.msk.bf16.mxu1 %vm1089_vm1, %v1088_v1 }
 0xdcf   :  { %995 = vmatprep.subr.bf16.mxu1 %v1088_v1 }
 0xdd2   :  { %996 = vmatpush3.bf16.msra.mxu1 %v1150_v4 }
 0xea0   :  { %v594_v12 = vpop.f32.mrb[12].mxu1 }
 0xea1   :  { %v595_v13 = vadd.f32 %v594_v12, %v149_v11  ;;  %v983_v14 = vpop.f32.mrb[13].mxu1 }
 0xea2   :  { %v597_v16 = vpop.f32.mrb[14].mxu1 }
 0xea3   :  { %1064 = vtanh.f32 %v595_v13  ;;  %v984_v17 = vpop.f32.mrb[15].mxu1  ;;  %v883_v2 = vmul.f32 -1.442695, %v595_v13 }
 0xea5   :  { %1066 = vpow2.f32 %v883_v2 }
 0xead   :  { %v1065_v18 = vpop.eup %1064 }
 0xeae   :  { %609 = vrot.lane.b32.xlu1 %v1065_v18, %s1090_s9 }
 0xeaf   :  { %v1067_v10 = vpop.eup %1066 }
 0xeb0   :  { %v603_v19 = vadd.f32 1.0, %v1067_v10 }
 0xeb2   :  { %1068 = vrcp.f32 %v603_v19 }
 0xebc   :  { %v1069_v20 = vpop.eup %1068 }
 0xebd   :  { %v607_v62 = vmul.f32 %v1069_v20, %v544_v0 }
 0xf20   :  { %v610_v21 = vpop.permute.xlu1 %609 }
 0xf21   :  { %v612_v4 = vmul.f32 %v1069_v20, %v610_v21 }
 0xf23   :  { %614 = vrot.lane.b32.xlu0 %v612_v4, %s1091_s3 }
 0xf95   :  { %v615_v22 = vpop.permute.xlu0 %614 }
 0xf96   :  { %v617_v23 = vadd.f32 %v615_v22, %v607_v62 }
 0xf98   :  { %1070 = vtanh.f32 %v617_v23 }
 0xfa2   :  { %v1071_v24 = vpop.eup %1070 }
 0xfa3   :  { %620 = vrot.lane.b32.xlu1 %v1071_v24, %s1090_s9 }
0x1015   :  { %v621_v25 = vpop.permute.xlu1 %620 }
0x1016   :  { %v623_v26 = vmul.f32 %v1069_v20, %v621_v25 }
0x1018   :  { %v624_v27 = vpack.c.bf16 %v623_v26, %v623_v26 }
0x101a   :  { %628 = vrot.lane.b32.xlu0 %v624_v27, %s1091_s3 }
0x108c   :  { %v629_v28 = vpop.permute.xlu0 %628 }
0x108d   :  { %990 = vmatmul.mubr.msk.bf16.vlgmr.msra.gmra.mrb[16].mxu0 %vm28_vm0, %v629_v28 }
0x108e   :  { %1005 = vmatprep.mubr.msk.bf16.mxu0 %vm1089_vm1, %v1088_v1  ;;  %1002 = vmatpush3.bf16.msra.mxu0 %v1022_v3 }
0x108f   :  { %1003 = vmatprep.subr.bf16.mxu0 %v1088_v1  ;;  %v888_v1 = vld [vmem:[%s1309_s5] ss:$0 sm:$0xff] }
0x1092   :  { %1004 = vmatpush3.bf16.msra.mxu0 %v1023_v5 }
0x1160   :  { %v667_v30 = vpop.f32.mrb[16].mxu0 }
0x1161   :  { %v668_v31 = vadd.f32 %v667_v30, %v154_v29  ;;  %v991_v32 = vpop.f32.mrb[17].mxu0 }
0x1162   :  { %v670_v33 = vpop.f32.mrb[18].mxu0 }
0x1163   :  { %1072 = vtanh.f32 %v668_v31  ;;  %v992_v34 = vpop.f32.mrb[19].mxu0  ;;  %v885_v36 = vmul.f32 -1.442695, %v668_v31 }
0x1165   :  { %1074 = vpow2.f32 %v885_v36 }
0x116d   :  { %v1073_v35 = vpop.eup %1072 }
0x116e   :  { %682 = vrot.lane.b32.xlu1 %v1073_v35, %s1090_s9 }
0x116f   :  { %v1075_v37 = vpop.eup %1074 }
0x1170   :  { %v676_v38 = vadd.f32 1.0, %v1075_v37 }
0x1172   :  { %1076 = vrcp.f32 %v676_v38 }
0x117c   :  { %v1077_v15 = vpop.eup %1076 }
0x117d   :  { %v680_v59 = vmul.f32 %v1077_v15, %v617_v23 }
0x11e0   :  { %v683_v39 = vpop.permute.xlu1 %682 }
0x11e1   :  { %v685_v40 = vmul.f32 %v1077_v15, %v683_v39 }
0x11e3   :  { %687 = vrot.lane.b32.xlu0 %v685_v40, %s1091_s3 }
0x1255   :  { %v688_v41 = vpop.permute.xlu0 %687 }
0x1256   :  { %v690_v42 = vadd.f32 %v688_v41, %v680_v59 }
0x1258   :  { %1078 = vtanh.f32 %v690_v42 }
0x1262   :  { %v1079_v43 = vpop.eup %1078 }
0x1263   :  { %693 = vrot.lane.b32.xlu1 %v1079_v43, %s1090_s9 }
0x12d5   :  { %v694_v44 = vpop.permute.xlu1 %693 }
0x12d6   :  { %v696_v45 = vmul.f32 %v1077_v15, %v694_v44 }
0x12d8   :  { %v697_v46 = vpack.c.bf16 %v696_v45, %v696_v45 }
0x12da   :  { %701 = vrot.lane.b32.xlu0 %v697_v46, %s1091_s3 }
0x134c   :  { %v702_v47 = vpop.permute.xlu0 %701 }
0x134d   :  { %998 = vmatmul.mubr.msk.bf16.vlgmr.msra.gmra.mrb[16].mxu1 %vm28_vm0, %v702_v47 }
0x1420   :  { %v740_v49 = vpop.f32.mrb[16].mxu1 }
0x1421   :  { %v741_v50 = vadd.f32 %v740_v49, %v157_v48  ;;  %v999_v51 = vpop.f32.mrb[17].mxu1 }
0x1422   :  { %v743_v52 = vpop.f32.mrb[18].mxu1 }
0x1423   :  { %1080 = vtanh.f32 %v741_v50  ;;  %v1000_v53 = vpop.f32.mrb[19].mxu1  ;;  %v887_v55 = vmul.f32 -1.442695, %v741_v50 }
0x1425   :  { %1082 = vpow2.f32 %v887_v55 }
0x142d   :  { %v1081_v54 = vpop.eup %1080 }
0x142e   :  { %755 = vrot.lane.b32.xlu1 %v1081_v54, %s1090_s9 }
0x142f   :  { %v1083_v56 = vpop.eup %1082 }
0x1430   :  { %v749_v57 = vadd.f32 1.0, %v1083_v56 }
0x1432   :  { %1084 = vrcp.f32 %v749_v57 }
0x143c   :  { %v1085_v58 = vpop.eup %1084 }
0x143d   :  { %v753_v9 = vmul.f32 %v1085_v58, %v690_v42 }
0x14a0   :  { %v756_v60 = vpop.permute.xlu1 %755 }
0x14a1   :  { %v758_v63 = vmul.f32 %v1085_v58, %v756_v60 }
0x14a3   :  { %760 = vrot.lane.b32.xlu0 %v758_v63, %s1091_s3 }
0x1515   :  { %v761_v61 = vpop.permute.xlu0 %760 }
0x1516   :  { %v763_v0 = vadd.f32 %v761_v61, %v753_v9 }
0x1518   :  { %1086 = vtanh.f32 %v763_v0 }
0x1522   :  { %v1087_v6 = vpop.eup %1086 }
0x1523   :  { %766 = vrot.lane.b32.xlu1 %v1087_v6, %s1090_s9 }
0x1595   :  { %v767_v7 = vpop.permute.xlu1 %766 }
0x1596   :  { %v769_v8 = vmul.f32 %v1085_v58, %v767_v7 }
0x1598   :  { %v783_v11 = vpack.c.bf16 %v769_v8, %v769_v8  ;;  %771 = vrot.lane.b32.xlu1 %v769_v8, %s1091_s3 }
0x159a   :  { %796 = vrot.lane.b32.xlu0 %v783_v11, %s1091_s3 }
0x159e   :  { %776 = vrot.lane.b32.xlu0 %v763_v0, %s1092_s17 }
0x160a   :  { %v772_v12 = vpop.permute.xlu1 %771 }
0x160b   :  { %774 = vst.msk [vmem:[#allocation3] sm:$0xff] %vm28_vm0, %v772_v12 }
0x160c   :  { %v797_v13 = vpop.permute.xlu0 %796 }
0x160d   :  { %1006 = vmatmul.mubr.msk.bf16.vlgmr.msra.gmra.mrb[20].mxu0 %vm28_vm0, %v797_v13 }
0x1610   :  { %v777_v14 = vpop.permute.xlu0 %776 }
0x1611   :  { %779 = vst.msk [vmem:[#allocation4] sm:$0xff] %vm28_vm0, %v777_v14 }
0x16e0   :  { %v847_v16 = vpop.f32.mrb[20].mxu0 }
0x16e1   :  { %v848_v17 = vadd.f32 %v888_v1, %v847_v16  ;;  %v1007_v18 = vpop.f32.mrb[21].mxu0 }
0x16e2   :  { %v850_v2 = vpop.f32.mrb[22].mxu0 }
0x16e3   :  { %854 = vst.msk [vmem:[%s1310_s6] sm:$0xff] %vm853_vm2, %v848_v17  ;;  %v1008_v10 = vpop.f32.mrb[23].mxu0 }

// kernel: lstm_model_forward.2
= control target key start
LH: loop header
LB: loop body
LE: loop exit
PB: predicated region body
PF: predicated region fallthrough
CT: control target
= control target key end

     0   :  { %vm22_vm0 = vcmask 261120   ;;  %v1059_v0 = vmov 0.0   ;;  %vm1060_vm1 = vmmov 0   ;;  %vm68_vm2 = vcmask 130048   ;;  %s1061_s25 = smov 64   ;;  %s1063_s15 = smov 96   ;;  %s1308_s1 = inlined_call_operand.vmem [shape: bf16[16,128], index: 1, kind: input, shape index: {}]   ;;  %s1309_s2 = inlined_call_operand.vmem [shape: bf16[32,128], index: 2, kind: input, shape index: {}]   ;;  %s1310_s0 = inlined_call_operand.vmem [shape: bf16[8,8,16], index: 0, kind: input, shape index: {}]   ;;  %s1311_s3 = inlined_call_operand.vmem [shape: f32[1,128], index: 3, kind: input, shape index: {}]   ;;  %s1312_s4 = inlined_call_operand.vmem [shape: bf16[8,8,32], index: 4, kind: output, shape index: {}]  }
   0x1   :  { %919 = vmatprep.subr.bf16.mxu1 %v1059_v0  ;;  %v988_v1 = vld [vmem:[%s1308_s1] sm:$0xff]   ;;  %923 = vmatprep.mubr.msk.bf16.mxu1 %vm1060_vm1, %v1059_v0  ;;  %23 = vst.msk [vmem:[#allocation3] sm:$0xff] %vm22_vm0, %v1059_v0  ;;  %24 = vst.msk [vmem:[#allocation4] sm:$0xff] %vm22_vm0, %v1059_v0  ;;  %v991_v4 = vld [vmem:[%s1310_s0 + $0x8] sm:$0xff]   ;;  %vm253_vm3 = vcmask 257024  }
   0x2   :  { %v1102_v2 = vld [vmem:[%s1309_s2] sm:$0xff]   ;;  %909 = vmatprep.subr.bf16.mxu0 %v988_v1  ;;  %v1116_v5 = vld [vmem:[%s1309_s2 + $0x8] sm:$0xff]   ;;  %v993_v52 = vld [vmem:[%s1310_s0 + $0x10] sm:$0xff]  }
   0x3   :  { %v990_v3 = vld [vmem:[%s1310_s0] sm:$0xff]   ;;  %920 = vmatpush3.bf16.msra.mxu1 %v1102_v2  ;;  %910 = vmatpush3.bf16.msra.mxu0 %v988_v1  ;;  %v994_v53 = vld [vmem:[%s1310_s0 + $0x18] sm:$0xff]  }
   0x4   :  { %911 = vmatprep.mubr.msk.bf16.mxu0 %vm68_vm2, %v990_v3  ;;  %921 = vmatprep.subr.bf16.mxu1 %v1059_v0  ;;  %v1136_v8 = vld [vmem:[%s1311_s3] ss:$0 sm:$0xff]  ;;  %s1062_s3 = smov 32  }
   0x5   :  { %935 = vmatprep.subr.bf16.mxu0 %v1059_v0 }
   0x6   :  { %912 = vmatmul.mubr.msk.bf16.vlgmr.msra.gmra.mrb[0].mxu0 %vm68_vm2, %v991_v4 }
   0x7   :  { %922 = vmatpush3.bf16.msra.mxu1 %v1116_v5  ;;  %936 = vmatpush3.bf16.msra.mxu0 %v1102_v2 }
   0x8   :  { %v158_v6 = vld [vmem:[#allocation3] sm:$0xff]  ;;  %927 = vmatprep.subr.bf16.mxu1 %v1059_v0  ;;  %937 = vmatprep.subr.bf16.mxu0 %v1059_v0  ;;  %v159_v20 = vld [vmem:[#allocation4] sm:$0xff] }
   0x9   :  { %v160_v7 = vpack.c.bf16 %v158_v6, %v158_v6  ;;  %915 = vmatprep.mubr.msk.bf16.mxu0 %vm68_vm2, %v993_v52 }
   0xb   :  { %924 = vmatmul.mubr.msk.bf16.vlgmr.msra.gmra.mrb[0].mxu1 %vm22_vm0, %v160_v7  ;;  %938 = vmatpush3.bf16.msra.mxu0 %v1116_v5 }
   0xc   :  { %928 = vmatpush3.bf16.msra.mxu1 %v1102_v2  ;;  %931 = vmatprep.mubr.msk.bf16.mxu1 %vm1060_vm1, %v1059_v0 }
   0xd   :  { %929 = vmatprep.subr.bf16.mxu1 %v1059_v0  ;;  %951 = vmatprep.subr.bf16.mxu0 %v1059_v0 }
   0xe   :  { %916 = vmatmul.mubr.msk.bf16.gmra.mrb[4].mxu0 %vm68_vm2, %v994_v53 }
   0xf   :  { %939 = vmatprep.mubr.msk.bf16.mxu0 %vm1060_vm1, %v1059_v0 }
  0x10   :  { %930 = vmatpush3.bf16.msra.mxu1 %v1116_v5 }
  0x11   :  { %943 = vmatprep.subr.bf16.mxu1 %v1059_v0 }
  0xd9   :  { %v1138_v9 = vpop.f32.mrb[0].mxu0 }
  0xda   :  { %v115_v10 = vpop.f32.mrb[1].mxu0  ;;  %v124_v63 = vadd.f32 %v1138_v9, %v1136_v8 }
  0xdb   :  { %v116_v11 = vadd.f32 %v1136_v8, %v115_v10  ;;  %v1141_v12 = vpop.f32.mrb[2].mxu0 }
  0xdc   :  { %v118_v13 = vpop.f32.mrb[3].mxu0 }
  0xdd   :  { %v119_v36 = vadd.f32 %v1136_v8, %v118_v13 }
  0xde   :  { %v212_v14 = vpop.f32.mrb[0].mxu1 }
  0xdf   :  { %v213_v15 = vadd.f32 %v212_v14, %v116_v11  ;;  %v925_v16 = vpop.f32.mrb[1].mxu1 }
  0xe0   :  { %v215_v17 = vpop.f32.mrb[2].mxu1 }
  0xe1   :  { %995 = vtanh.f32 %v213_v15  ;;  %v926_v18 = vpop.f32.mrb[3].mxu1  ;;  %v842_v21 = vmul.f32 -1.442695, %v213_v15  ;;  %v1176_v58 = vpop.f32.mrb[4].mxu0 }
  0xe2   :  { %v1178_v59 = vpop.f32.mrb[5].mxu0 }
  0xe3   :  { %997 = vpow2.f32 %v842_v21  ;;  %v1180_v60 = vpop.f32.mrb[6].mxu0 }
  0xe4   :  { %v1182_v61 = vpop.f32.mrb[7].mxu0 }
  0xeb   :  { %v996_v19 = vpop.eup %995 }
  0xec   :  { %231 = vrot.lane.b32.xlu0 %v996_v19, %s1061_s25 }
  0xed   :  { %v998_v22 = vpop.eup %997 }
  0xee   :  { %v221_v23 = vadd.f32 1.0, %v998_v22 }
  0xf0   :  { %226 = vrot.lane.b32.xlu0 %v159_v20, %s1062_s3  ;;  %999 = vrcp.f32 %v221_v23 }
  0xfa   :  { %v1000_v24 = vpop.eup %999 }
 0x15e   :  { %v232_v25 = vpop.permute.xlu0 %231 }
 0x15f   :  { %v234_v26 = vmul.f32 %v1000_v24, %v232_v25  ;;  %v127_v25 = vadd.f32 %v1141_v12, %v1136_v8 }
 0x161   :  { %236 = vrot.lane.b32.xlu1 %v234_v26, %s1062_s3 }
 0x162   :  { %v227_v27 = vpop.permute.xlu0 %226 }
 0x163   :  { %v229_v28 = vmul.f32 %v1000_v24, %v227_v27 }
 0x1d3   :  { %v237_v29 = vpop.permute.xlu1 %236 }
 0x1d4   :  { %v239_v30 = vadd.f32 %v237_v29, %v229_v28 }
 0x1d6   :  { %1001 = vtanh.f32 %v239_v30 }
 0x1e0   :  { %v1002_v31 = vpop.eup %1001 }
 0x1e1   :  { %242 = vrot.lane.b32.xlu1 %v1002_v31, %s1061_s25 }
 0x253   :  { %v243_v32 = vpop.permute.xlu1 %242 }
 0x254   :  { %v245_v33 = vmul.f32 %v1000_v24, %v243_v32 }
 0x256   :  { %v1147_v34 = vpack.c.bf16 %v245_v33, %v245_v33 }
 0x258   :  { %257 = vrot.lane.b32.xlu0 %v1147_v34, %s1062_s3 }
 0x2ca   :  { %v258_v35 = vpop.permute.xlu0 %257 }
 0x2cb   :  { %932 = vmatmul.mubr.msk.bf16.vlgmr.msra.gmra.mrb[4].mxu1 %vm22_vm0, %v258_v35 }
 0x2cc   :  { %944 = vmatpush3.bf16.msra.mxu1 %v1102_v2  ;;  %947 = vmatprep.mubr.msk.bf16.mxu1 %vm1060_vm1, %v1059_v0 }
 0x2cd   :  { %945 = vmatprep.subr.bf16.mxu1 %v1059_v0 }
 0x2d0   :  { %946 = vmatpush3.bf16.msra.mxu1 %v1116_v5 }
 0x2d1   :  { %959 = vmatprep.subr.bf16.mxu1 %v1059_v0 }
 0x39e   :  { %v296_v37 = vpop.f32.mrb[4].mxu1 }
 0x39f   :  { %v297_v38 = vadd.f32 %v296_v37, %v119_v36  ;;  %v933_v39 = vpop.f32.mrb[5].mxu1 }
 0x3a0   :  { %v299_v40 = vpop.f32.mrb[6].mxu1 }
 0x3a1   :  { %1003 = vtanh.f32 %v297_v38  ;;  %v934_v41 = vpop.f32.mrb[7].mxu1  ;;  %v845_v43 = vmul.f32 -1.442695, %v297_v38 }
 0x3a3   :  { %1005 = vpow2.f32 %v845_v43 }
 0x3ab   :  { %v1004_v42 = vpop.eup %1003 }
 0x3ac   :  { %311 = vrot.lane.b32.xlu1 %v1004_v42, %s1061_s25 }
 0x3ad   :  { %v1006_v44 = vpop.eup %1005 }
 0x3ae   :  { %v305_v45 = vadd.f32 1.0, %v1006_v44 }
 0x3b0   :  { %1007 = vrcp.f32 %v305_v45 }
 0x3ba   :  { %v1008_v46 = vpop.eup %1007 }
 0x3bb   :  { %v309_v49 = vmul.f32 %v1008_v46, %v239_v30 }
 0x41e   :  { %v312_v47 = vpop.permute.xlu1 %311 }
 0x41f   :  { %v314_v48 = vmul.f32 %v1008_v46, %v312_v47 }
 0x421   :  { %316 = vrot.lane.b32.xlu0 %v314_v48, %s1062_s3 }
 0x493   :  { %v317_v50 = vpop.permute.xlu0 %316 }
 0x494   :  { %v319_v51 = vadd.f32 %v317_v50, %v309_v49 }
 0x496   :  { %1009 = vtanh.f32 %v319_v51 }
 0x4a0   :  { %v1010_v54 = vpop.eup %1009 }
 0x4a1   :  { %322 = vrot.lane.b32.xlu1 %v1010_v54, %s1061_s25 }
 0x513   :  { %v323_v55 = vpop.permute.xlu1 %322 }
 0x514   :  { %v325_v56 = vmul.f32 %v1008_v46, %v323_v55  ;;  %v132_v46 = vadd.f32 %v1136_v8, %v1178_v59 }
 0x516   :  { %v1172_v57 = vpack.c.bf16 %v325_v56, %v325_v56 }
 0x518   :  { %337 = vrot.lane.b32.xlu0 %v1172_v57, %s1062_s3 }
 0x58a   :  { %v338_v62 = vpop.permute.xlu0 %337 }
 0x58b   :  { %940 = vmatmul.mubr.msk.bf16.vlgmr.msra.gmra.mrb[8].mxu0 %vm22_vm0, %v338_v62 }
 0x58c   :  { %952 = vmatpush3.bf16.msra.mxu0 %v1102_v2  ;;  %955 = vmatprep.mubr.msk.bf16.mxu0 %vm1060_vm1, %v1059_v0 }
 0x58d   :  { %953 = vmatprep.subr.bf16.mxu0 %v1059_v0 }
 0x590   :  { %954 = vmatpush3.bf16.msra.mxu0 %v1116_v5 }
 0x591   :  { %967 = vmatprep.subr.bf16.mxu0 %v1059_v0 }
 0x65e   :  { %v376_v1 = vpop.f32.mrb[8].mxu0 }
 0x65f   :  { %v377_v3 = vadd.f32 %v376_v1, %v124_v63  ;;  %v941_v4 = vpop.f32.mrb[9].mxu0 }
 0x660   :  { %v379_v6 = vpop.f32.mrb[10].mxu0 }
 0x661   :  { %1011 = vtanh.f32 %v377_v3  ;;  %v942_v7 = vpop.f32.mrb[11].mxu0  ;;  %v849_v11 = vmul.f32 -1.442695, %v377_v3 }
 0x663   :  { %1013 = vpow2.f32 %v849_v11 }
 0x66b   :  { %v1012_v10 = vpop.eup %1011 }
 0x66c   :  { %391 = vrot.lane.b32.xlu1 %v1012_v10, %s1061_s25 }
 0x66d   :  { %v1014_v13 = vpop.eup %1013 }
 0x66e   :  { %v385_v14 = vadd.f32 1.0, %v1014_v13  ;;  %v135_v13 = vadd.f32 %v1136_v8, %v1182_v61 }
 0x670   :  { %1015 = vrcp.f32 %v385_v14 }
 0x67a   :  { %v1016_v15 = vpop.eup %1015 }
 0x67b   :  { %v389_v9 = vmul.f32 %v1016_v15, %v319_v51 }
 0x6de   :  { %v392_v16 = vpop.permute.xlu1 %391 }
 0x6df   :  { %v394_v17 = vmul.f32 %v1016_v15, %v392_v16 }
 0x6e1   :  { %396 = vrot.lane.b32.xlu0 %v394_v17, %s1062_s3 }
 0x753   :  { %v397_v18 = vpop.permute.xlu0 %396 }
 0x754   :  { %v399_v19 = vadd.f32 %v397_v18, %v389_v9 }
 0x756   :  { %1017 = vtanh.f32 %v399_v19 }
 0x760   :  { %v1018_v20 = vpop.eup %1017 }
 0x761   :  { %402 = vrot.lane.b32.xlu1 %v1018_v20, %s1061_s25 }
 0x7d3   :  { %v403_v21 = vpop.permute.xlu1 %402 }
 0x7d4   :  { %v405_v22 = vmul.f32 %v1016_v15, %v403_v21 }
 0x7d6   :  { %v1196_v23 = vpack.c.bf16 %v405_v22, %v405_v22 }
 0x7d8   :  { %417 = vrot.lane.b32.xlu0 %v1196_v23, %s1062_s3 }
 0x84a   :  { %v418_v24 = vpop.permute.xlu0 %417 }
 0x84b   :  { %948 = vmatmul.mubr.msk.bf16.vlgmr.msra.gmra.mrb[8].mxu1 %vm22_vm0, %v418_v24 }
 0x84c   :  { %960 = vmatpush3.bf16.msra.mxu1 %v1102_v2  ;;  %963 = vmatprep.mubr.msk.bf16.mxu1 %vm1060_vm1, %v1059_v0 }
 0x84d   :  { %961 = vmatprep.subr.bf16.mxu1 %v1059_v0 }
 0x850   :  { %962 = vmatpush3.bf16.msra.mxu1 %v1116_v5 }
 0x851   :  { %975 = vmatprep.subr.bf16.mxu1 %v1059_v0 }
 0x91e   :  { %v456_v26 = vpop.f32.mrb[8].mxu1 }
 0x91f   :  { %v457_v27 = vadd.f32 %v456_v26, %v127_v25  ;;  %v949_v28 = vpop.f32.mrb[9].mxu1 }
 0x920   :  { %v459_v29 = vpop.f32.mrb[10].mxu1 }
 0x921   :  { %1019 = vtanh.f32 %v457_v27  ;;  %v950_v30 = vpop.f32.mrb[11].mxu1  ;;  %v853_v32 = vmul.f32 -1.442695, %v457_v27 }
 0x922   :  { %v140_v30 = vadd.f32 %v1176_v58, %v1136_v8 }
 0x923   :  { %1021 = vpow2.f32 %v853_v32 }
 0x92b   :  { %v1020_v31 = vpop.eup %1019 }
 0x92c   :  { %471 = vrot.lane.b32.xlu1 %v1020_v31, %s1061_s25 }
 0x92d   :  { %v1022_v33 = vpop.eup %1021 }
 0x92e   :  { %v465_v35 = vadd.f32 1.0, %v1022_v33 }
 0x930   :  { %1023 = vrcp.f32 %v465_v35 }
 0x93a   :  { %v1024_v36 = vpop.eup %1023 }
 0x93b   :  { %v469_v12 = vmul.f32 %v1024_v36, %v399_v19 }
 0x99e   :  { %v472_v37 = vpop.permute.xlu1 %471 }
 0x99f   :  { %v474_v38 = vmul.f32 %v1024_v36, %v472_v37 }
 0x9a1   :  { %476 = vrot.lane.b32.xlu0 %v474_v38, %s1062_s3 }
 0xa13   :  { %v477_v39 = vpop.permute.xlu0 %476 }
 0xa14   :  { %v479_v40 = vadd.f32 %v477_v39, %v469_v12 }
 0xa16   :  { %1025 = vtanh.f32 %v479_v40 }
 0xa20   :  { %v1026_v41 = vpop.eup %1025 }
 0xa21   :  { %482 = vrot.lane.b32.xlu1 %v1026_v41, %s1061_s25 }
 0xa93   :  { %v483_v42 = vpop.permute.xlu1 %482 }
 0xa94   :  { %v485_v43 = vmul.f32 %v1024_v36, %v483_v42 }
 0xa96   :  { %v1212_v44 = vpack.c.bf16 %v485_v43, %v485_v43 }
 0xa98   :  { %497 = vrot.lane.b32.xlu0 %v1212_v44, %s1062_s3 }
 0xb0a   :  { %v498_v45 = vpop.permute.xlu0 %497 }
 0xb0b   :  { %956 = vmatmul.mubr.msk.bf16.vlgmr.msra.gmra.mrb[12].mxu0 %vm22_vm0, %v498_v45 }
 0xb0c   :  { %968 = vmatpush3.bf16.msra.mxu0 %v1102_v2  ;;  %971 = vmatprep.mubr.msk.bf16.mxu0 %vm1060_vm1, %v1059_v0 }
 0xb0d   :  { %969 = vmatprep.subr.bf16.mxu0 %v1059_v0 }
 0xb10   :  { %970 = vmatpush3.bf16.msra.mxu0 %v1116_v5 }
 0xbde   :  { %v536_v47 = vpop.f32.mrb[12].mxu0 }
 0xbdf   :  { %v537_v48 = vadd.f32 %v536_v47, %v132_v46  ;;  %v957_v49 = vpop.f32.mrb[13].mxu0 }
 0xbe0   :  { %v539_v50 = vpop.f32.mrb[14].mxu0 }
 0xbe1   :  { %1027 = vtanh.f32 %v537_v48  ;;  %v958_v51 = vpop.f32.mrb[15].mxu0  ;;  %v857_v53 = vmul.f32 -1.442695, %v537_v48 }
 0xbe2   :  { %v143_v51 = vadd.f32 %v1180_v60, %v1136_v8 }
 0xbe3   :  { %1029 = vpow2.f32 %v857_v53 }
 0xbeb   :  { %v1028_v52 = vpop.eup %1027 }
 0xbec   :  { %551 = vrot.lane.b32.xlu1 %v1028_v52, %s1061_s25 }
 0xbed   :  { %v1030_v54 = vpop.eup %1029 }
 0xbee   :  { %v545_v55 = vadd.f32 1.0, %v1030_v54 }
 0xbf0   :  { %1031 = vrcp.f32 %v545_v55 }
 0xbfa   :  { %v1032_v56 = vpop.eup %1031 }
 0xbfb   :  { %v549_v59 = vmul.f32 %v1032_v56, %v479_v40 }
 0xc5e   :  { %v552_v62 = vpop.permute.xlu1 %551 }
 0xc5f   :  { %v554_v63 = vmul.f32 %v1032_v56, %v552_v62 }
 0xc61   :  { %556 = vrot.lane.b32.xlu0 %v554_v63, %s1062_s3 }
 0xcd3   :  { %v557_v1 = vpop.permute.xlu0 %556 }
 0xcd4   :  { %v559_v3 = vadd.f32 %v557_v1, %v549_v59 }
 0xcd6   :  { %1033 = vtanh.f32 %v559_v3 }
 0xce0   :  { %v1034_v4 = vpop.eup %1033 }
 0xce1   :  { %562 = vrot.lane.b32.xlu1 %v1034_v4, %s1061_s25 }
 0xd53   :  { %v563_v6 = vpop.permute.xlu1 %562 }
 0xd54   :  { %v565_v7 = vmul.f32 %v1032_v56, %v563_v6 }
 0xd56   :  { %v1227_v10 = vpack.c.bf16 %v565_v7, %v565_v7 }
 0xd58   :  { %577 = vrot.lane.b32.xlu0 %v1227_v10, %s1062_s3 }
 0xdca   :  { %v578_v11 = vpop.permute.xlu0 %577 }
 0xdcb   :  { %964 = vmatmul.mubr.msk.bf16.vlgmr.msra.gmra.mrb[12].mxu1 %vm22_vm0, %v578_v11 }
 0xdcc   :  { %976 = vmatpush3.bf16.msra.mxu1 %v1102_v2  ;;  %979 = vmatprep.mubr.msk.bf16.mxu1 %vm1060_vm1, %v1059_v0 }
 0xdcd   :  { %977 = vmatprep.subr.bf16.mxu1 %v1059_v0 }
 0xdd0   :  { %978 = vmatpush3.bf16.msra.mxu1 %v1116_v5 }
 0xe9e   :  { %v616_v14 = vpop.f32.mrb[12].mxu1 }
 0xe9f   :  { %v617_v15 = vadd.f32 %v616_v14, %v135_v13  ;;  %v965_v16 = vpop.f32.mrb[13].mxu1 }
 0xea0   :  { %v619_v17 = vpop.f32.mrb[14].mxu1 }
 0xea1   :  { %1035 = vtanh.f32 %v617_v15  ;;  %v966_v9 = vpop.f32.mrb[15].mxu1  ;;  %v861_v2 = vmul.f32 -1.442695, %v617_v15 }
 0xea3   :  { %1037 = vpow2.f32 %v861_v2 }
 0xeab   :  { %v1036_v18 = vpop.eup %1035 }
 0xeac   :  { %631 = vrot.lane.b32.xlu1 %v1036_v18, %s1061_s25 }
 0xead   :  { %v1038_v19 = vpop.eup %1037 }
 0xeae   :  { %v625_v20 = vadd.f32 1.0, %v1038_v19 }
 0xeb0   :  { %1039 = vrcp.f32 %v625_v20 }
 0xeba   :  { %v1040_v0 = vpop.eup %1039 }
 0xebb   :  { %v629_v61 = vmul.f32 %v1040_v0, %v559_v3 }
 0xf1e   :  { %v632_v21 = vpop.permute.xlu1 %631 }
 0xf1f   :  { %v634_v5 = vmul.f32 %v1040_v0, %v632_v21 }
 0xf21   :  { %636 = vrot.lane.b32.xlu0 %v634_v5, %s1062_s3 }
 0xf93   :  { %v637_v22 = vpop.permute.xlu0 %636 }
 0xf94   :  { %v639_v24 = vadd.f32 %v637_v22, %v629_v61 }
 0xf96   :  { %1041 = vtanh.f32 %v639_v24 }
 0xfa0   :  { %v1042_v25 = vpop.eup %1041 }
 0xfa1   :  { %642 = vrot.lane.b32.xlu1 %v1042_v25, %s1061_s25 }
0x1013   :  { %v643_v26 = vpop.permute.xlu1 %642 }
0x1014   :  { %v645_v27 = vmul.f32 %v1040_v0, %v643_v26 }
0x1016   :  { %v1242_v28 = vpack.c.bf16 %v645_v27, %v645_v27 }
0x1018   :  { %657 = vrot.lane.b32.xlu0 %v1242_v28, %s1062_s3 }
0x108a   :  { %v658_v29 = vpop.permute.xlu0 %657 }
0x108b   :  { %972 = vmatmul.mubr.msk.bf16.vlgmr.msra.gmra.mrb[16].mxu0 %vm22_vm0, %v658_v29 }
0x115e   :  { %v696_v31 = vpop.f32.mrb[16].mxu0 }
0x115f   :  { %v697_v32 = vadd.f32 %v696_v31, %v140_v30  ;;  %v973_v33 = vpop.f32.mrb[17].mxu0 }
0x1160   :  { %v699_v35 = vpop.f32.mrb[18].mxu0 }
0x1161   :  { %1043 = vtanh.f32 %v697_v32  ;;  %v974_v36 = vpop.f32.mrb[19].mxu0  ;;  %v865_v38 = vmul.f32 -1.442695, %v697_v32 }
0x1163   :  { %1045 = vpow2.f32 %v865_v38 }
0x116b   :  { %v1044_v37 = vpop.eup %1043 }
0x116c   :  { %711 = vrot.lane.b32.xlu1 %v1044_v37, %s1061_s25 }
0x116d   :  { %v1046_v12 = vpop.eup %1045 }
0x116e   :  { %v705_v39 = vadd.f32 1.0, %v1046_v12 }
0x1170   :  { %1047 = vrcp.f32 %v705_v39 }
0x117a   :  { %v1048_v40 = vpop.eup %1047 }
0x117b   :  { %v709_v58 = vmul.f32 %v1048_v40, %v639_v24 }
0x11de   :  { %v712_v41 = vpop.permute.xlu1 %711 }
0x11df   :  { %v714_v42 = vmul.f32 %v1048_v40, %v712_v41 }
0x11e1   :  { %716 = vrot.lane.b32.xlu0 %v714_v42, %s1062_s3 }
0x1253   :  { %v717_v43 = vpop.permute.xlu0 %716 }
0x1254   :  { %v719_v45 = vadd.f32 %v717_v43, %v709_v58 }
0x1256   :  { %1049 = vtanh.f32 %v719_v45 }
0x1260   :  { %v1050_v46 = vpop.eup %1049 }
0x1261   :  { %722 = vrot.lane.b32.xlu1 %v1050_v46, %s1061_s25 }
0x12d3   :  { %v723_v47 = vpop.permute.xlu1 %722 }
0x12d4   :  { %v725_v48 = vmul.f32 %v1048_v40, %v723_v47 }
0x12d6   :  { %v726_v49 = vpack.c.bf16 %v725_v48, %v725_v48 }
0x12d8   :  { %737 = vrot.lane.b32.xlu0 %v726_v49, %s1062_s3 }
0x134a   :  { %v738_v50 = vpop.permute.xlu0 %737 }
0x134b   :  { %980 = vmatmul.mubr.msk.bf16.vlgmr.msra.gmra.mrb[16].mxu1 %vm22_vm0, %v738_v50 }
0x141e   :  { %v776_v52 = vpop.f32.mrb[16].mxu1 }
0x141f   :  { %v777_v53 = vadd.f32 %v776_v52, %v143_v51  ;;  %v981_v54 = vpop.f32.mrb[17].mxu1 }
0x1420   :  { %v779_v55 = vpop.f32.mrb[18].mxu1 }
0x1421   :  { %1051 = vtanh.f32 %v777_v53  ;;  %v982_v56 = vpop.f32.mrb[19].mxu1  ;;  %v869_v63 = vmul.f32 -1.442695, %v777_v53 }
0x1423   :  { %1053 = vpow2.f32 %v869_v63 }
0x142b   :  { %v1052_v62 = vpop.eup %1051 }
0x142c   :  { %791 = vrot.lane.b32.xlu1 %v1052_v62, %s1061_s25 }
0x142d   :  { %v1054_v59 = vpop.eup %1053 }
0x142e   :  { %v785_v1 = vadd.f32 1.0, %v1054_v59 }
0x1430   :  { %1055 = vrcp.f32 %v785_v1 }
0x143a   :  { %v1056_v3 = vpop.eup %1055 }
0x143b   :  { %v789_v8 = vmul.f32 %v1056_v3, %v719_v45 }
0x149e   :  { %v792_v4 = vpop.permute.xlu1 %791 }
0x149f   :  { %v794_v6 = vmul.f32 %v1056_v3, %v792_v4 }
0x14a1   :  { %796 = vrot.lane.b32.xlu0 %v794_v6, %s1062_s3 }
0x14a5   :  { %250 = vrot.lane.b32.xlu0 %v1147_v34, %s1062_s3 }
0x14a9   :  { %410 = vrot.lane.b32.xlu0 %v1196_v23, %s1062_s3 }
0x14ad   :  { %570 = vrot.lane.b32.xlu0 %v1227_v10, %s1062_s3 }
0x14b1   :  { %730 = vrot.lane.b32.xlu0 %v726_v49, %s1062_s3 }
0x1513   :  { %v797_v60 = vpop.permute.xlu0 %796 }
0x1514   :  { %v799_v7 = vadd.f32 %v797_v60, %v789_v8 }
0x1516   :  { %1057 = vtanh.f32 %v799_v7 }
0x1517   :  { %v251_v11 = vpop.permute.xlu0 %250 }
0x1518   :  { %254 = vst.msk [vmem:[%s1312_s4] sm:$0xf] %vm253_vm3, %v251_v11 }
0x151b   :  { %v411_v34 = vpop.permute.xlu0 %410 }
0x151c   :  { %851 = vst.msk [vmem:[%s1312_s4 + $0x8] sm:$0xf] %vm253_vm3, %v411_v34 }
0x151f   :  { %v571_v23 = vpop.permute.xlu0 %570 }
0x1520   :  { %v1058_v10 = vpop.eup %1057  ;;  %859 = vst.msk [vmem:[%s1312_s4 + $0x10] sm:$0xf] %vm253_vm3, %v571_v23 }
0x1521   :  { %802 = vrot.lane.b32.xlu1 %v1058_v10, %s1061_s25 }
0x1523   :  { %v731_v13 = vpop.permute.xlu0 %730 }
0x1524   :  { %867 = vst.msk [vmem:[%s1312_s4 + $0x18] sm:$0xf] %vm253_vm3, %v731_v13 }
0x1525   :  { %330 = vrot.lane.b32.xlu1 %v1172_v57, %s1062_s3 }
0x1529   :  { %490 = vrot.lane.b32.xlu1 %v1212_v44, %s1062_s3 }
0x152d   :  { %650 = vrot.lane.b32.xlu1 %v1242_v28, %s1062_s3 }
0x1593   :  { %v803_v14 = vpop.permute.xlu1 %802 }
0x1594   :  { %v805_v15 = vmul.f32 %v1056_v3, %v803_v14 }
0x1596   :  { %v879_v16 = vpack.c.bf16 %v805_v15, %v805_v15  ;;  %816 = vrot.lane.b32.xlu0 %v805_v15, %s1062_s3 }
0x1597   :  { %v331_v17 = vpop.permute.xlu1 %330 }
0x1598   :  { %847 = vst.msk [vmem:[%s1312_s4 + $0x4] sm:$0xf] %vm253_vm3, %v331_v17  ;;  %810 = vrot.lane.b32.xlu1 %v879_v16, %s1062_s3 }
0x159b   :  { %v491_v57 = vpop.permute.xlu1 %490 }
0x159c   :  { %855 = vst.msk [vmem:[%s1312_s4 + $0xc] sm:$0xf] %vm253_vm3, %v491_v57  ;;  %821 = vrot.lane.b32.xlu1 %v799_v7, %s1063_s15 }
0x159f   :  { %v651_v44 = vpop.permute.xlu1 %650 }
0x15a0   :  { %863 = vst.msk [vmem:[%s1312_s4 + $0x14] sm:$0xf] %vm253_vm3, %v651_v44 }
0x1608   :  { %v817_v9 = vpop.permute.xlu0 %816 }
0x1609   :  { %819 = vst.msk [vmem:[#allocation3] sm:$0xff] %vm22_vm0, %v817_v9 }
0x160a   :  { %v811_v18 = vpop.permute.xlu1 %810 }
0x160b   :  { %871 = vst.msk [vmem:[%s1312_s4 + $0x1c] sm:$0xf] %vm253_vm3, %v811_v18 }
0x160e   :  { %v822_v2 = vpop.permute.xlu1 %821 }
0x160f   :  { %824 = vst.msk [vmem:[#allocation4] sm:$0xff] %vm22_vm0, %v822_v2 }

</bundles_post_ra>
